<compile_context>
chip_gen: v7x
topology: tpu7x:2x2x1
jax: 0.10.0
libtpu: 0.0.40
codegen_flags: <defaults>
</compile_context>

<pallas_src>
import numpy as np
import jax
import jax.numpy as jnp
from jax.experimental import pallas as pl
from jax.experimental.pallas import tpu as pltpu


def _round_up(v, m):
    return (v + m - 1) // m * m


def _bilstm_kernel(x_ref, len_ref, wih_ref, b_ref, whh_ref,
                   ho_ref, ht_ref, ct_ref,
                   xg_ref, h_st, c_st):
    Tc, Bb, Dp = x_ref.shape
    Hp = h_st.shape[-1]
    G4 = 4 * Hp

    d = pl.program_id(1)                        # 0 = forward, 1 = backward
    tc = pl.program_id(2)                       # position along the (arbitrary) chunk axis
    n_tc = pl.num_programs(2)
    chunk = tc + d * (n_tc - 1 - 2 * tc)        # backward walks chunks in reverse (matches index_map)
    t_off = chunk * Tc

    # ---- per-chunk input projection: one bf16 MXU pass, stored bf16 (half the scratch bytes)
    x2 = x_ref[...].reshape(Tc * Bb, Dp)
    xg = jnp.dot(x2, wih_ref[0], preferred_element_type=jnp.float32)
    xg_ref[...] = xg.astype(jnp.bfloat16).reshape(Tc, Bb, G4)

    @pl.when(tc == 0)
    def _():
        h_st[...] = jnp.zeros_like(h_st)
        c_st[...] = jnp.zeros_like(c_st)

    whh = whh_ref[0]            # (Hp, 4Hp) bf16, constant across steps
    bias = b_ref[0]             # (1, 4Hp) f32, added per step (no double rounding)
    lens = len_ref[...]         # (Bb, 1) int32

    # TODO(synk): on v6e/v7x the gate nonlinearities could run in bf16 (2x EUP rate);
    # kept f32 here so the same kernel lowers safely on v5e (no bf16 VPU/EUP).
    @pl.loop(0, Tc)
    def _(step):
        t_loc = step + d * (Tc - 1 - 2 * step)          # backward walks the chunk right->left
        rec = jnp.dot(h_st[...].astype(jnp.bfloat16), whh,
                      preferred_element_type=jnp.float32)              # (Bb, 4Hp)
        gates = xg_ref[t_loc].astype(jnp.float32) + rec + bias
        # gate order (i,f,o,g): one contiguous lane-aligned block for i/f/o;
        # sigmoid via tanh -> a single EUP op per element.
        ifo = 0.5 * jnp.tanh(0.5 * gates[:, 0:3 * Hp]) + 0.5
        g_g = jnp.tanh(gates[:, 3 * Hp:4 * Hp])
        h_old = h_st[...]
        c_old = c_st[...]
        c_new = ifo[:, Hp:2 * Hp] * c_old + ifo[:, 0:Hp] * g_g
        h_new = ifo[:, 2 * Hp:3 * Hp] * jnp.tanh(c_new)
        m = (lens > (t_off + t_loc)).astype(jnp.float32)               # (Bb, 1)
        # packed-sequence semantics: freeze state / zero output when masked
        h_st[...] = h_old + m * (h_new - h_old)
        c_st[...] = c_old + m * (c_new - c_old)
        ho_ref[t_loc] = (m * h_new).astype(ho_ref.dtype)

    @pl.when(tc == n_tc - 1)
    def _():
        ht_ref[0] = h_st[...]
        ct_ref[0] = c_st[...]


def init_bilstm_params(key, input_dim, hidden_dim):
    """Deterministic init mimicking torch.nn.LSTM default U(-1/sqrt(H), 1/sqrt(H))."""
    k = 1.0 / np.sqrt(hidden_dim)
    names = ['w_ih_f', 'w_hh_f', 'b_ih_f', 'b_hh_f',
             'w_ih_b', 'w_hh_b', 'b_ih_b', 'b_hh_b']
    shapes = [(4 * hidden_dim, input_dim), (4 * hidden_dim, hidden_dim),
              (4 * hidden_dim,), (4 * hidden_dim,)] * 2
    keys = jax.random.split(key, len(names))
    return {n: jax.random.uniform(kk, s, jnp.float32, -k, k)
            for n, s, kk in zip(names, shapes, keys)}


def _reorder_pad_gates(w, H, Hp):
    """(4H, ...) torch gate order (i,f,g,o) -> (4Hp, ...) order (i,f,o,g), each gate zero-padded.

    Zero-padded gate rows give preact 0 -> i=f=o=0.5, g=0, so padded hidden units stay
    exactly zero (c_pad = 0.5*0 + 0.5*0 = 0, h_pad = 0.5*tanh(0) = 0)."""
    i, f, g, o = w[:H], w[H:2 * H], w[2 * H:3 * H], w[3 * H:4 * H]
    pad = [(0, Hp - H)] + [(0, 0)] * (w.ndim - 1)
    return jnp.concatenate([jnp.pad(a, pad) for a in (i, f, o, g)], axis=0)


def bilstm_forward(x, x_len, params, hidden_dim):
    """x: (B, T, D) float32, x_len: (B,) int32. Returns (h, (ht, ct)) like torch BiLSTM."""
    B, T, D = x.shape
    H = hidden_dim
    Hp = _round_up(H, 128)                      # lane-aligned hidden size
    Dp = _round_up(D, 128)                      # lane-aligned input size
    G4 = 4 * Hp

    # ---- tile selection driven by an explicit per-program VMEM budget
    Bb = min(_round_up(B, 16), 128)             # batch tile (bf16-sublane friendly)
    Tc = min(T, 32)                             # time chunk

    def vmem_need(tc_, bb_):
        xg = tc_ * bb_ * G4 * 2                               # bf16 xg scratch
        st = 2 * bb_ * Hp * 4                                 # h/c state scratch
        x_blk = tc_ * bb_ * Dp * 2                            # bf16 x chunk
        w_blk = Dp * G4 * 2 + Hp * G4 * 2 + 8 * G4 * 4        # wih + whh + bias blocks
        len_blk = bb_ * 128 * 4                               # (Bb,1) int32, lane-padded
        ho_blk = tc_ * bb_ * Hp * 2                           # bf16 output chunk
        hc_blk = 2 * (bb_ * Hp * 4)                           # ht + ct blocks
        # grid blocks are double-buffered by the pipeline; scratch is single-buffered
        return xg + st + 2 * (x_blk + w_blk + len_blk + ho_blk + hc_blk)

    budget = 44 << 20                           # leaves headroom on v7x's 64 MiB VMEM
    while vmem_need(Tc, Bb) > budget and Tc > 8:
        Tc = max(8, Tc // 2)
    while vmem_need(Tc, Bb) > budget and Bb > 16:
        Bb = max(16, Bb // 2)

    T_pad = _round_up(T, Tc)
    B_pad = _round_up(B, Bb)
    nb = B_pad // Bb
    n_tc = T_pad // Tc
    vmem_limit = int(max(vmem_need(Tc, Bb) + (8 << 20), 32 << 20))

    # ---- inputs: cast to bf16 BEFORE the transpose, time-major, padded
    x_tbd = jnp.transpose(x.astype(jnp.bfloat16), (1, 0, 2))             # (T, B, D) bf16
    x_tbd = jnp.pad(x_tbd, ((0, T_pad - T), (0, B_pad - B), (0, Dp - D)))
    lens = jnp.pad(x_len.astype(jnp.int32), (0, B_pad - B)).reshape(B_pad, 1)

    # ---- weights: per-gate pad to Hp, reorder gates to (i,f,o,g), stack the two directions
    def prep_dir(suffix):
        wih = _reorder_pad_gates(params['w_ih_' + suffix], H, Hp)         # (4Hp, D)
        wih = jnp.pad(wih, ((0, 0), (0, Dp - D))).T                       # (Dp, 4Hp)
        whh = _reorder_pad_gates(params['w_hh_' + suffix], H, Hp)         # (4Hp, H)
        whh = jnp.pad(whh, ((0, 0), (0, Hp - H))).T                       # (Hp, 4Hp)
        b = _reorder_pad_gates(params['b_ih_' + suffix] + params['b_hh_' + suffix], H, Hp)
        return wih, whh, b

    wih_f, whh_f, b_f = prep_dir('f')
    wih_b, whh_b, b_b = prep_dir('b')
    wih_st = jnp.stack([wih_f, wih_b]).astype(jnp.bfloat16)               # (2, Dp, 4Hp)
    whh_st = jnp.stack([whh_f, whh_b]).astype(jnp.bfloat16)               # (2, Hp, 4Hp)
    bias_st = jnp.stack([b_f, b_b]).reshape(2, 1, G4).astype(jnp.float32) # (2, 1, 4Hp)

    def chunk_of(d, tc):                       # backward direction walks chunks in reverse
        return tc + d * (n_tc - 1 - 2 * tc)

    out_shape = (jax.ShapeDtypeStruct((T_pad, B_pad, 2 * Hp), jnp.bfloat16),  # fused [hf | hb]
                 jax.ShapeDtypeStruct((2, B_pad, Hp), jnp.float32),           # ht
                 jax.ShapeDtypeStruct((2, B_pad, Hp), jnp.float32))           # ct

    h_out, ht, ct = pl.pallas_call(
        _bilstm_kernel,
        out_shape=out_shape,
        grid=(nb, 2, n_tc),
        in_specs=[
            pl.BlockSpec((Tc, Bb, Dp), lambda b, d, tc: (chunk_of(d, tc), b, 0)),   # x chunk
            pl.BlockSpec((Bb, 1), lambda b, d, tc: (b, 0)),                         # lengths
            pl.BlockSpec((1, Dp, G4), lambda b, d, tc: (d, 0, 0)),                  # Wih (this dir)
            pl.BlockSpec((1, 1, G4), lambda b, d, tc: (d, 0, 0)),                   # bias (this dir)
            pl.BlockSpec((1, Hp, G4), lambda b, d, tc: (d, 0, 0)),                  # Whh (this dir)
        ],
        out_specs=(
            pl.BlockSpec((Tc, Bb, Hp), lambda b, d, tc: (chunk_of(d, tc), b, d)),   # fused h
            pl.BlockSpec((1, Bb, Hp), lambda b, d, tc: (d, b, 0)),                  # ht
            pl.BlockSpec((1, Bb, Hp), lambda b, d, tc: (d, b, 0)),                  # ct
        ),
        scratch_shapes=[
            pltpu.VMEM((Tc, Bb, G4), jnp.bfloat16),   # x@Wih chunk (bf16)
            pltpu.VMEM((Bb, Hp), jnp.float32),        # h state (carried across chunks)
            pltpu.VMEM((Bb, Hp), jnp.float32),        # c state (carried across chunks)
        ],
        compiler_params=pltpu.CompilerParams(
            dimension_semantics=("parallel", "parallel", "arbitrary"),
            vmem_limit_bytes=vmem_limit),
    )(x_tbd, lens, wih_st, bias_st, whh_st)

    if H == Hp:
        h = h_out[:T, :B, :].astype(jnp.float32)                           # already [hf | hb]
    else:
        h = jnp.concatenate([h_out[:T, :B, :H], h_out[:T, :B, Hp:Hp + H]],
                            axis=-1).astype(jnp.float32)
    h = jnp.transpose(h, (1, 0, 2))                                        # (B, T, 2H)
    return h, (ht[:, :B, :H], ct[:, :B, :H])


# ----------------------------- pure numpy reference -----------------------------
def _sigmoid(x):
    return 1.0 / (1.0 + np.exp(-x))


def ref_bilstm(x, x_len, P, H):
    x = np.asarray(x, np.float32)
    x_len = np.asarray(x_len)
    B, T, D = x.shape

    def one_dir(Wih, Whh, bih, bhh, reverse):
        out = np.zeros((B, T, H), np.float32)
        ht = np.zeros((B, H), np.float32)
        ct = np.zeros((B, H), np.float32)
        for b in range(B):
            h = np.zeros(H, np.float32)
            c = np.zeros(H, np.float32)
            L = int(x_len[b])
            ts = range(L - 1, -1, -1) if reverse else range(L)
            for t in ts:
                g = Wih @ x[b, t] + bih + Whh @ h + bhh
                i = _sigmoid(g[:H]); f = _sigmoid(g[H:2 * H])
                gg = np.tanh(g[2 * H:3 * H]); o = _sigmoid(g[3 * H:])
                c = f * c + i * gg
                h = o * np.tanh(c)
                out[b, t] = h
            ht[b] = h
            ct[b] = c
        return out, ht, ct

    of, htf, ctf = one_dir(np.asarray(P['w_ih_f']), np.asarray(P['w_hh_f']),
                           np.asarray(P['b_ih_f']), np.asarray(P['b_hh_f']), False)
    ob, htb, ctb = one_dir(np.asarray(P['w_ih_b']), np.asarray(P['w_hh_b']),
                           np.asarray(P['b_ih_b']), np.asarray(P['b_hh_b']), True)
    T_out = int(x_len.max())
    h = np.concatenate([of, ob], axis=-1)[:, :T_out]
    return h, np.stack([htf, htb]), np.stack([ctf, ctb])


if __name__ == "__main__":
    B, T, D, H = 2, 8, 16, 32
    key = jax.random.PRNGKey(0)
    kx, kp = jax.random.split(key)
    x = jax.random.normal(kx, (B, T, D), jnp.float32)
    x_len_np = np.array([8, 5], dtype=np.int32)      # variable sequence lengths
    x_len = jnp.asarray(x_len_np)
    params = init_bilstm_params(kp, D, H)

    h_full, (ht, ct) = bilstm_forward(x, x_len, params, H)
    T_out = int(x_len_np.max())                      # pad_packed_sequence output length
    h = h_full[:, :T_out, :]
    jax.block_until_ready((h, ht, ct))

    h_ref, ht_ref, ct_ref = ref_bilstm(np.asarray(x), x_len_np, params, H)
    assert h.shape == (B, T_out, 2 * H)
    assert ht.shape == (2, B, H) and ct.shape == (2, B, H)
    ok = (np.allclose(np.asarray(h), h_ref, atol=5e-2, rtol=5e-2)
          and np.allclose(np.asarray(ht), ht_ref, atol=5e-2, rtol=5e-2)
          and np.allclose(np.asarray(ct), ct_ref, atol=5e-2, rtol=5e-2))
    if not ok:
        raise AssertionError("Pallas BiLSTM does not match reference")
    print("KERNEL_OK")
</pallas_src>

<mosaic_0001>
module attributes {stable_mosaic.version = 11 : i64} {
  func.func @_bilstm_kernel(%arg0: i32, %arg1: i32, %arg2: i32, %arg3: memref<8x16x128xbf16, #tpu.memory_space<vmem>>, %arg4: memref<16x1xi32, #tpu.memory_space<vmem>>, %arg5: memref<1x128x512xbf16, #tpu.memory_space<vmem>>, %arg6: memref<1x1x512xf32, #tpu.memory_space<vmem>>, %arg7: memref<1x128x512xbf16, #tpu.memory_space<vmem>>, %arg8: memref<8x16x128xbf16, #tpu.memory_space<vmem>>, %arg9: memref<1x16x128xf32, #tpu.memory_space<vmem>>, %arg10: memref<1x16x128xf32, #tpu.memory_space<vmem>>, %arg11: memref<8x16x512xbf16, #tpu.memory_space<vmem>>, %arg12: memref<16x128xf32, #tpu.memory_space<vmem>>, %arg13: memref<16x128xf32, #tpu.memory_space<vmem>>) attributes {dimension_semantics = [#tpu.dimension_semantics<parallel>, #tpu.dimension_semantics<parallel>, #tpu.dimension_semantics<arbitrary>], iteration_bounds = array<i64: 1, 2, 1>, scalar_prefetch = 0 : i64, scratch_operands = 3 : i64, tpu.core_type = #tpu.core_type<tc>, window_params = [{transform_indices = @transform_0, window_bounds = array<i64: 8, 16, 128>}, {transform_indices = @transform_1, window_bounds = array<i64: 16, 1>}, {transform_indices = @transform_2, window_bounds = array<i64: 1, 128, 512>}, {transform_indices = @transform_3, window_bounds = array<i64: 1, 1, 512>}, {transform_indices = @transform_4, window_bounds = array<i64: 1, 128, 512>}, {transform_indices = @transform_5, window_bounds = array<i64: 8, 16, 128>}, {transform_indices = @transform_6, window_bounds = array<i64: 1, 16, 128>}, {transform_indices = @transform_7, window_bounds = array<i64: 1, 16, 128>}]} {
    %c2_i32 = arith.constant 2 : i32
    %0 = arith.muli %c2_i32, %arg2 : i32
    %c0_i32 = arith.constant 0 : i32
    %1 = arith.subi %c0_i32, %0 : i32
    %2 = arith.muli %arg1, %1 : i32
    %3 = arith.addi %arg2, %2 : i32
    %c8_i32 = arith.constant 8 : i32
    %4 = arith.muli %3, %c8_i32 : i32
    %c0 = arith.constant 0 : index
    %c0_0 = arith.constant 0 : index
    %c0_1 = arith.constant 0 : index
    %5 = vector.load %arg3[%c0, %c0_0, %c0_1] : memref<8x16x128xbf16, #tpu.memory_space<vmem>>, vector<8x16x128xbf16>
    %6 = vector.shape_cast %5 : vector<8x16x128xbf16> to vector<128x128xbf16>
    %c0_2 = arith.constant 0 : index
    %c0_3 = arith.constant 0 : index
    %c0_4 = arith.constant 0 : index
    %7 = vector.load %arg5[%c0_2, %c0_3, %c0_4] : memref<1x128x512xbf16, #tpu.memory_space<vmem>>, vector<1x128x512xbf16>
    %8 = vector.shape_cast %7 : vector<1x128x512xbf16> to vector<128x512xbf16>
    %cst = arith.constant dense<0.000000e+00> : vector<128x512xf32>
    %9 = tpu.matmul %6, %8, %cst {dimension_numbers = #tpu.dot_dimension_numbers<[1], [0], [0], [1], [0, 0, 1, 1], [], []>} : vector<128x128xbf16>, vector<128x512xbf16>, vector<128x512xf32> -> vector<128x512xf32>
    %10 = arith.truncf %9 : vector<128x512xf32> to vector<128x512xbf16>
    %11 = vector.shape_cast %10 : vector<128x512xbf16> to vector<8x16x512xbf16>
    %c0_5 = arith.constant 0 : index
    %c0_6 = arith.constant 0 : index
    %c0_7 = arith.constant 0 : index
    %12 = vector.load %arg11[%c0_5, %c0_6, %c0_7] : memref<8x16x512xbf16, #tpu.memory_space<vmem>>, vector<8x16x512xbf16>
    tpu.vector_store %arg11[%c0_5, %c0_6, %c0_7], %11 {strides = array<i32>} : memref<8x16x512xbf16, #tpu.memory_space<vmem>>, vector<8x16x512xbf16>,
    %c0_i32_8 = arith.constant 0 : i32
    %13 = arith.cmpi eq, %arg2, %c0_i32_8 : i32
    %14 = arith.extui %13 : i1 to i32
    %c0_i32_9 = arith.constant 0 : i32
    %15 = arith.cmpi ne, %14, %c0_i32_9 : i32
    scf.if %15 {
      %cst_23 = arith.constant 0.000000e+00 : f32
      %25 = vector.broadcast %cst_23 : f32 to vector<16x128xf32>
      %c0_24 = arith.constant 0 : index
      %c0_25 = arith.constant 0 : index
      %26 = vector.load %arg12[%c0_24, %c0_25] : memref<16x128xf32, #tpu.memory_space<vmem>>, vector<16x128xf32>
      tpu.vector_store %arg12[%c0_24, %c0_25], %25 {strides = array<i32>} : memref<16x128xf32, #tpu.memory_space<vmem>>, vector<16x128xf32>,
      %cst_26 = arith.constant 0.000000e+00 : f32
      %27 = vector.broadcast %cst_26 : f32 to vector<16x128xf32>
      %c0_27 = arith.constant 0 : index
      %c0_28 = arith.constant 0 : index
      %28 = vector.load %arg13[%c0_27, %c0_28] : memref<16x128xf32, #tpu.memory_space<vmem>>, vector<16x128xf32>
      tpu.vector_store %arg13[%c0_27, %c0_28], %27 {strides = array<i32>} : memref<16x128xf32, #tpu.memory_space<vmem>>, vector<16x128xf32>,
    } else {
    }
    %c0_10 = arith.constant 0 : index
    %c0_11 = arith.constant 0 : index
    %c0_12 = arith.constant 0 : index
    %16 = vector.load %arg7[%c0_10, %c0_11, %c0_12] : memref<1x128x512xbf16, #tpu.memory_space<vmem>>, vector<1x128x512xbf16>
    %17 = vector.shape_cast %16 : vector<1x128x512xbf16> to vector<128x512xbf16>
    %c0_13 = arith.constant 0 : index
    %c0_14 = arith.constant 0 : index
    %c0_15 = arith.constant 0 : index
    %18 = vector.load %arg6[%c0_13, %c0_14, %c0_15] : memref<1x1x512xf32, #tpu.memory_space<vmem>>, vector<1x1x512xf32>
    %19 = vector.shape_cast %18 : vector<1x1x512xf32> to vector<1x512xf32>
    %c0_16 = arith.constant 0 : index
    %c0_17 = arith.constant 0 : index
    %20 = vector.load %arg4[%c0_16, %c0_17] : memref<16x1xi32, #tpu.memory_space<vmem>>, vector<16x1xi32>
    %c0_i32_18 = arith.constant 0 : i32
    %c8_i32_19 = arith.constant 8 : i32
    %21 = arith.addi %c0_i32_18, %c8_i32_19 : i32
    %c1_i32 = arith.constant 1 : i32
    scf.for %arg14 = %c0_i32_18 to %21 step %c1_i32  : i32 {
      %c1_i32_23 = arith.constant 1 : i32
      %25 = arith.muli %arg14, %c1_i32_23 : i32
      %c0_i32_24 = arith.constant 0 : i32
      %26 = arith.addi %c0_i32_24, %25 : i32
      %c2_i32_25 = arith.constant 2 : i32
      %27 = arith.muli %c2_i32_25, %26 : i32
      %c7_i32 = arith.constant 7 : i32
      %28 = arith.subi %c7_i32, %27 : i32
      %29 = arith.muli %arg1, %28 : i32
      %30 = arith.addi %26, %29 : i32
      %c0_26 = arith.constant 0 : index
      %c0_27 = arith.constant 0 : index
      %31 = vector.load %arg12[%c0_26, %c0_27] : memref<16x128xf32, #tpu.memory_space<vmem>>, vector<16x128xf32>
      %32 = arith.truncf %31 : vector<16x128xf32> to vector<16x128xbf16>
      %cst_28 = arith.constant dense<0.000000e+00> : vector<16x512xf32>
      %33 = tpu.matmul %32, %17, %cst_28 {dimension_numbers = #tpu.dot_dimension_numbers<[1], [0], [0], [1], [0, 0, 1, 1], [], []>} : vector<16x128xbf16>, vector<128x512xbf16>, vector<16x512xf32> -> vector<16x512xf32>
      %34 = arith.index_cast %30 : i32 to index
      %c0_29 = arith.constant 0 : index
      %c0_30 = arith.constant 0 : index
      %35 = vector.load %arg11[%34, %c0_29, %c0_30] : memref<8x16x512xbf16, #tpu.memory_space<vmem>>, vector<1x16x512xbf16>
      %36 = vector.shape_cast %35 : vector<1x16x512xbf16> to vector<16x512xbf16>
      %37 = arith.extf %36 : vector<16x512xbf16> to vector<16x512xf32>
      %38 = arith.addf %37, %33 : vector<16x512xf32>
      %39 = vector.broadcast %19 : vector<1x512xf32> to vector<16x512xf32>
      %40 = arith.addf %38, %39 : vector<16x512xf32>
      %41 = vector.extract_strided_slice %40 {offsets = [0, 0], sizes = [16, 384], strides = [1, 1]} : vector<16x512xf32> to vector<16x384xf32>
      %cst_31 = arith.constant 5.000000e-01 : f32
      %42 = vector.broadcast %cst_31 : f32 to vector<16x384xf32>
      %43 = arith.mulf %42, %41 : vector<16x384xf32>
      %44 = math.tanh %43 : vector<16x384xf32>
      %cst_32 = arith.constant 5.000000e-01 : f32
      %45 = vector.broadcast %cst_32 : f32 to vector<16x384xf32>
      %46 = arith.mulf %45, %44 : vector<16x384xf32>
      %cst_33 = arith.constant 5.000000e-01 : f32
      %47 = vector.broadcast %cst_33 : f32 to vector<16x384xf32>
      %48 = arith.addf %46, %47 : vector<16x384xf32>
      %49 = vector.extract_strided_slice %40 {offsets = [0, 384], sizes = [16, 128], strides = [1, 1]} : vector<16x512xf32> to vector<16x128xf32>
      %50 = math.tanh %49 : vector<16x128xf32>
      %c0_34 = arith.constant 0 : index
      %c0_35 = arith.constant 0 : index
      %51 = vector.load %arg12[%c0_34, %c0_35] : memref<16x128xf32, #tpu.memory_space<vmem>>, vector<16x128xf32>
      %c0_36 = arith.constant 0 : index
      %c0_37 = arith.constant 0 : index
      %52 = vector.load %arg13[%c0_36, %c0_37] : memref<16x128xf32, #tpu.memory_space<vmem>>, vector<16x128xf32>
      %53 = vector.extract_strided_slice %48 {offsets = [0, 128], sizes = [16, 128], strides = [1, 1]} : vector<16x384xf32> to vector<16x128xf32>
      %54 = arith.mulf %53, %52 : vector<16x128xf32>
      %55 = vector.extract_strided_slice %48 {offsets = [0, 0], sizes = [16, 128], strides = [1, 1]} : vector<16x384xf32> to vector<16x128xf32>
      %56 = arith.mulf %55, %50 : vector<16x128xf32>
      %57 = arith.addf %54, %56 : vector<16x128xf32>
      %58 = vector.extract_strided_slice %48 {offsets = [0, 256], sizes = [16, 128], strides = [1, 1]} : vector<16x384xf32> to vector<16x128xf32>
      %59 = math.tanh %57 : vector<16x128xf32>
      %60 = arith.mulf %58, %59 : vector<16x128xf32>
      %61 = arith.addi %4, %30 : i32
      %62 = vector.broadcast %61 : i32 to vector<16x1xi32>
      %63 = arith.cmpi sgt, %20, %62 : vector<16x1xi32>
      %64 = arith.extui %63 : vector<16x1xi1> to vector<16x1xi32>
      %65 = arith.sitofp %64 : vector<16x1xi32> to vector<16x1xf32>
      %66 = arith.subf %60, %51 : vector<16x128xf32>
      %67 = vector.broadcast %65 : vector<16x1xf32> to vector<16x128xf32>
      %68 = arith.mulf %67, %66 : vector<16x128xf32>
      %69 = arith.addf %51, %68 : vector<16x128xf32>
      %c0_38 = arith.constant 0 : index
      %c0_39 = arith.constant 0 : index
      %70 = vector.load %arg12[%c0_38, %c0_39] : memref<16x128xf32, #tpu.memory_space<vmem>>, vector<16x128xf32>
      tpu.vector_store %arg12[%c0_38, %c0_39], %69 {strides = array<i32>} : memref<16x128xf32, #tpu.memory_space<vmem>>, vector<16x128xf32>,
      %71 = arith.subf %57, %52 : vector<16x128xf32>
      %72 = vector.broadcast %65 : vector<16x1xf32> to vector<16x128xf32>
      %73 = arith.mulf %72, %71 : vector<16x128xf32>
      %74 = arith.addf %52, %73 : vector<16x128xf32>
      %c0_40 = arith.constant 0 : index
      %c0_41 = arith.constant 0 : index
      %75 = vector.load %arg13[%c0_40, %c0_41] : memref<16x128xf32, #tpu.memory_space<vmem>>, vector<16x128xf32>
      tpu.vector_store %arg13[%c0_40, %c0_41], %74 {strides = array<i32>} : memref<16x128xf32, #tpu.memory_space<vmem>>, vector<16x128xf32>,
      %76 = vector.broadcast %65 : vector<16x1xf32> to vector<16x128xf32>
      %77 = arith.mulf %76, %60 : vector<16x128xf32>
      %78 = arith.truncf %77 : vector<16x128xf32> to vector<16x128xbf16>
      %79 = arith.index_cast %30 : i32 to index
      %c0_42 = arith.constant 0 : index
      %c0_43 = arith.constant 0 : index
      %80 = vector.load %arg8[%79, %c0_42, %c0_43] : memref<8x16x128xbf16, #tpu.memory_space<vmem>>, vector<1x16x128xbf16>
      %81 = vector.shape_cast %80 : vector<1x16x128xbf16> to vector<16x128xbf16>
      %82 = vector.shape_cast %78 : vector<16x128xbf16> to vector<1x16x128xbf16>
      tpu.vector_store %arg8[%79, %c0_42, %c0_43], %82 {strides = array<i32>} : memref<8x16x128xbf16, #tpu.memory_space<vmem>>, vector<1x16x128xbf16>,
    }
    %c8_i32_20 = arith.constant 8 : i32
    %c0_i32_21 = arith.constant 0 : i32
    %22 = arith.cmpi eq, %arg2, %c0_i32_21 : i32
    %23 = arith.extui %22 : i1 to i32
    %c0_i32_22 = arith.constant 0 : i32
    %24 = arith.cmpi ne, %23, %c0_i32_22 : i32
    scf.if %24 {
      %c0_23 = arith.constant 0 : index
      %c0_24 = arith.constant 0 : index
      %25 = vector.load %arg12[%c0_23, %c0_24] : memref<16x128xf32, #tpu.memory_space<vmem>>, vector<16x128xf32>
      %c0_25 = arith.constant 0 : index
      %c0_26 = arith.constant 0 : index
      %c0_27 = arith.constant 0 : index
      %26 = vector.load %arg9[%c0_25, %c0_26, %c0_27] : memref<1x16x128xf32, #tpu.memory_space<vmem>>, vector<1x16x128xf32>
      %27 = vector.shape_cast %26 : vector<1x16x128xf32> to vector<16x128xf32>
      %28 = vector.shape_cast %25 : vector<16x128xf32> to vector<1x16x128xf32>
      tpu.vector_store %arg9[%c0_25, %c0_26, %c0_27], %28 {strides = array<i32>} : memref<1x16x128xf32, #tpu.memory_space<vmem>>, vector<1x16x128xf32>,
      %c0_28 = arith.constant 0 : index
      %c0_29 = arith.constant 0 : index
      %29 = vector.load %arg13[%c0_28, %c0_29] : memref<16x128xf32, #tpu.memory_space<vmem>>, vector<16x128xf32>
      %c0_30 = arith.constant 0 : index
      %c0_31 = arith.constant 0 : index
      %c0_32 = arith.constant 0 : index
      %30 = vector.load %arg10[%c0_30, %c0_31, %c0_32] : memref<1x16x128xf32, #tpu.memory_space<vmem>>, vector<1x16x128xf32>
      %31 = vector.shape_cast %30 : vector<1x16x128xf32> to vector<16x128xf32>
      %32 = vector.shape_cast %29 : vector<16x128xf32> to vector<1x16x128xf32>
      tpu.vector_store %arg10[%c0_30, %c0_31, %c0_32], %32 {strides = array<i32>} : memref<1x16x128xf32, #tpu.memory_space<vmem>>, vector<1x16x128xf32>,
    } else {
    }
    return
  }
  func.func @transform_0(%arg0: i32, %arg1: i32, %arg2: i32) -> (i32, i32, i32) {
    %c2_i32 = arith.constant 2 : i32
    %0 = arith.muli %c2_i32, %arg2 : i32
    %c0_i32 = arith.constant 0 : i32
    %1 = arith.subi %c0_i32, %0 : i32
    %2 = arith.muli %arg1, %1 : i32
    %3 = arith.addi %arg2, %2 : i32
    %c0_i32_0 = arith.constant 0 : i32
    %c0_i32_1 = arith.constant 0 : i32
    return %3, %arg0, %c0_i32_0 : i32, i32, i32
  }
  func.func @transform_1(%arg0: i32, %arg1: i32, %arg2: i32) -> (i32, i32) {
    %c0_i32 = arith.constant 0 : i32
    %c0_i32_0 = arith.constant 0 : i32
    return %arg0, %c0_i32 : i32, i32
  }
  func.func @transform_2(%arg0: i32, %arg1: i32, %arg2: i32) -> (i32, i32, i32) {
    %c0_i32 = arith.constant 0 : i32
    %c0_i32_0 = arith.constant 0 : i32
    %c0_i32_1 = arith.constant 0 : i32
    return %arg1, %c0_i32, %c0_i32_0 : i32, i32, i32
  }
  func.func @transform_3(%arg0: i32, %arg1: i32, %arg2: i32) -> (i32, i32, i32) {
    %c0_i32 = arith.constant 0 : i32
    %c0_i32_0 = arith.constant 0 : i32
    %c0_i32_1 = arith.constant 0 : i32
    return %arg1, %c0_i32, %c0_i32_0 : i32, i32, i32
  }
  func.func @transform_4(%arg0: i32, %arg1: i32, %arg2: i32) -> (i32, i32, i32) {
    %c0_i32 = arith.constant 0 : i32
    %c0_i32_0 = arith.constant 0 : i32
    %c0_i32_1 = arith.constant 0 : i32
    return %arg1, %c0_i32, %c0_i32_0 : i32, i32, i32
  }
  func.func @transform_5(%arg0: i32, %arg1: i32, %arg2: i32) -> (i32, i32, i32) {
    %c2_i32 = arith.constant 2 : i32
    %0 = arith.muli %c2_i32, %arg2 : i32
    %c0_i32 = arith.constant 0 : i32
    %1 = arith.subi %c0_i32, %0 : i32
    %2 = arith.muli %arg1, %1 : i32
    %3 = arith.addi %arg2, %2 : i32
    %c0_i32_0 = arith.constant 0 : i32
    return %3, %arg0, %arg1 : i32, i32, i32
  }
  func.func @transform_6(%arg0: i32, %arg1: i32, %arg2: i32) -> (i32, i32, i32) {
    %c0_i32 = arith.constant 0 : i32
    %c0_i32_0 = arith.constant 0 : i32
    return %arg1, %arg0, %c0_i32 : i32, i32, i32
  }
  func.func @transform_7(%arg0: i32, %arg1: i32, %arg2: i32) -> (i32, i32, i32) {
    %c0_i32 = arith.constant 0 : i32
    %c0_i32_0 = arith.constant 0 : i32
    return %arg1, %arg0, %c0_i32 : i32, i32, i32
  }
}

</mosaic_0001>

<bundles_post_ra>
// kernel: tpu_custom_call.1
= control target key start
LH: loop header
LB: loop body
LE: loop exit
PB: predicated region body
PF: predicated region fallthrough
CT: control target
= control target key end

     0   :  { %s3050_s0 = inlined_call_operand.hbm [shape: bf16[8,16,128], index: 0, kind: input, shape index: {}]   ;;  %s3051_s1 = inlined_call_operand.vmem [shape: s32[16,1], index: 1, kind: input, shape index: {}]   ;;  %s3052_s2 = inlined_call_operand.hbm [shape: bf16[2,128,512], index: 2, kind: input, shape index: {}]   ;;  %s3053_s3 = inlined_call_operand.vmem [shape: f32[2,1,512], index: 3, kind: input, shape index: {}]   ;;  %s3054_s4 = inlined_call_operand.hbm [shape: bf16[2,128,512], index: 4, kind: input, shape index: {}]   ;;  %s3055_s5 = inlined_call_operand.hbm [shape: bf16[8,16,256], index: 5, kind: output, shape index: {0}]   ;;  %s3056_s6 = inlined_call_operand.hbm [shape: f32[2,16,128], index: 6, kind: output, shape index: {1}]   ;;  %s3057_s7 = inlined_call_operand.hbm [shape: f32[2,16,128], index: 7, kind: output, shape index: {2}]  }
   0x1   :  { %3081 = sst [smem:[#allocation31_spill]] %s3052_s2 }
   0x2   :  { %13 = vsyncpa [#allocation6], 0 }
   0x3   :  { %15 = vsyncpa [#allocation6 + $0x1], 0 }
   0x4   :  { %16 = vsyncpa [#allocation9], 0 }
   0x5   :  { %18 = vsyncpa [#allocation9 + $0x1], 0 }
   0x6   :  { %19 = vsyncpa [#allocation7], 0 }
   0x7   :  { %21 = vsyncpa [#allocation7 + $0x1], 0 }
   0x8   :  { %22 = vsyncpa [#allocation13], 0 }
   0x9   :  { %24 = vsyncpa [#allocation13 + $0x1], 0  ;;  %s2426_s24 = smov 0   ;;  %s2428_s25 = smov 0  }
   0xa   :  { %s2430_s26 = smov 0   ;;  %s2432_s27 = smov 0  }
   0xb   :  { %s2434_s28 = smov 0   ;;  %s2436_s29 = smov 0  }
   0xc LB: > { %3082 = sst [smem:[#allocation19_spill]] %s2350_s26  ;;  %s2457_s30 = sadd.s32 4294967295, %s2362_s29   ;;  %s2362_s29 = sphi %s2436_s29, %s30_s29   ;;  %s2358_s28 = sphi %s2434_s28, %s3129_s28   ;;  %s2354_s27 = sphi %s2432_s27, %s3128_s27   ;;  %s2350_s26 = sphi %s2430_s26, %s3132_s26   ;;  %s2346_s25 = sphi %s2428_s25, %s3131_s25   ;;  %s2342_s24 = sphi %s2426_s24, %s3130_s24  }
   0xd   : > { %3083 = sst [smem:[#allocation20_spill]] %s2358_s28  ;;  %s3058_s8 = sadd.s32 4294967294, %s2362_s29  }
   0xe   : > { %s45_s9 = sadd.s32 1, %s2358_s28  ;;  %s118_s10 = sadd.s32 1, %s2350_s26 }
   0xf   : > { %p47_p0 = scmp.ge.s32.totalorder %s45_s9, 2  ;;  %p125_p1 = scmp.ne.s32.totalorder %s2350_s26, %s2346_s25 }
  0x10   : > { %p3063_p2 = scmp.eq.s32.totalorder %s2362_s29, 0  ;;  %p131_p3 = scmp.ne.s32.totalorder %s2346_s25, %s2342_s24 }
  0x11   : > { %s3134_s9 = smov (%p47_p0, %s45_s9), 0  ;;  %p3061_p5 = scmp.eq.s32.totalorder %s2457_s30, 0 }
  0x12   : > { %3084 = sst [smem:[#allocation21_spill]] %s3134_s9  ;;  %p2471_p4 = por %p3063_p2, %p125_p1 }
  0x13   : > { %s115_s12 = ssub.s32 %s2358_s28, %s3134_s9  ;;  %p219_p6 = scmp.eq.s32.totalorder %s2457_s30, 1 }
  0x14   : > { %p116_p7 = scmp.eq.s32.totalorder %s115_s12, 0  ;;  %p2481_p8 = por %p3061_p5, %p131_p3 }
  0x15   : > { %p2485_p9 = por %p219_p6, %p125_p1  ;;  %p225_p10 = scmp.eq.s32.totalorder %s3058_s8, 1 }
  0x16   : > { %s3086_s13 = scalar_select %p2481_p8, 1, 0 }
  0x17   : > { %s3087_s14 = scalar_select %p2485_p9, 1, 0 }
  0x18   : > { %s2492_s15 = scalar_select %p116_p7, %s2350_s26, %s118_s10  }
  0x19   : > { %p2494_p11 = por %p225_p10, %p131_p3  ;;  %p3062_p13 = scmp.lt.s32.totalorder %s2362_s29, 2 }
  0x1a   : > { %3088 = sst [smem:[#allocation22_spill]] %s2492_s15  ;;  %s338_s17 = sand.u32 1, %s2362_s29  }
  0x1b   : > { %s3089_s16 = scalar_select %p2494_p11, 1, 0 }
  0x1c   : > { %s340_s18 = sand.u32 1, %s2350_s26   ;;  %s3059_s20 = sshll.u32 %s2358_s28, 12 }
  0x1d   : > { %3090 = sst [smem:[#allocation23_spill]] %s3089_s16  ;;  %s2502_s19 = sshll.u32 %s340_s18, 8 }
  0x1e   : > { %s3091_s2 = sld [smem:[#allocation31_spill]]  ;;  %s342_s10 = scalar_lea.vmem [#allocation8], %s2502_s19 }
  0x1f   : > { %s349_s12 = sshll.u32 %s342_s10, 4  ;;  %p2519_p0 = pnand %p3062_p13, %p2471_p4  ;;  %s2513_s12 = int_to_ptr.vmem [resolvable:$true] %s349_s12 }
  0x20   : > { %s2523_s8 = scalar_lea.sflag [#allocation9], %s338_s17 }
  0x21   : > { %s3092_s18 = scalar_select %p2519_p0, 1, 0 }
  0x22   : > { %p3068_p3 = pneg %p2519_p0 }
  0x24   : > { %s2510_s23 = scalar_lea.hbm %s3091_s2, %s3059_s20  ;;  %s2129_s11 = scalar_lea.hbm %s3091_s2, 8192 }
  0x25   : > { %s2124_s21 = scalar_lea.hbm %s2510_s23, 4096  ;;  %p2130_p4 = scmp.lt.u32.totalorder %s2510_s23, %s3091_s2 }
  0x26   : > { %p2125_p1 = scmp.ne.s32.totalorder %s2510_s23, %s2124_s21  ;;  %p2131_p10 = scmp.lt.u32.totalorder %s2129_s11, %s2124_s21 }
  0x27   : > { %p2133_p5 = scmp.lt.u32.totalorder %s2124_s21, %s2510_s23 }
  0x28   : > { %p2127_p6 = pnand %p3068_p3, %p2125_p1  ;;  %p2132_p12 = por %p2131_p10, %p2130_p4 }
  0x2a   : > { %p2128_p7 = pneg %p2127_p6  ;;  %p2134_p13 = por %p2133_p5, %p2132_p12 }
  0x2c   : > { %p2135_p2 = pnand %p2134_p13, %p2128_p7 }
  0x2e   : > { %2138 = shalt.err (!%p2135_p2)
}
  0x2f   : > { %s2139_s17 = scalar_lea.vmem %s2513_s12, 4096  ;;  %s2368_s22 = smov [#allocation8]  }
  0x30   : > { %p2140_p1 = scmp.ne.s32.totalorder %s2513_s12, %s2139_s17  ;;  %s2144_s10 = sshll.u32 %s2368_s22, 4  ;;  %s2145_s10 = int_to_ptr.vmem [resolvable:$false] %s2144_s10 }
  0x31   : > { %s2146_s9 = scalar_lea.vmem %s2145_s10, 8192  ;;  %p2147_p9 = scmp.lt.s32.totalorder %s2513_s12, %s2145_s10 }
  0x32   : > { %p2142_p6 = pnand %p2140_p1, %p3068_p3  ;;  %p2148_p4 = scmp.lt.s32.totalorder %s2146_s9, %s2139_s17 }
  0x34   : > { %p2143_p11 = pneg %p2142_p6  ;;  %p2149_p10 = por %p2148_p4, %p2147_p9 }
  0x36   : > { %p2150_p5 = pnand %p2149_p10, %p2143_p11 }
  0x38   : > { %2153 = shalt.err (!%p2150_p5)
}
  0x39   : > { %s3067_s20 = smov 256   ;;  %s3072_s21 = smov 16  }
  0x3a   : > { %1955 = dma.hbm_to_vmem [thread:$0]  (!%p2519_p0), %s2510_s23, 4096, %s2513_s12, %s2523_s8, %s3067_s20, %s3067_s20, %s3072_s21  }
  0x3b   : > { %s3093_s11 = sshll.u32 %s2358_s28, 12  ;;  %s370_s9 = scalar_lea.vmem [#allocation10], %s2502_s19 }
  0x3c   : > { %s2559_s10 = scalar_lea.hbm %s3054_s4, %s3093_s11  ;;  %s377_s2 = sshll.u32 %s370_s9, 4  ;;  %s2562_s2 = int_to_ptr.vmem [resolvable:$true] %s377_s2 }
  0x3d   : > { %p1823_p2 = scmp.ge.s32.totalorder %s2362_s29, 1  ;;  %p385_p9 = scmp.lt.s32.totalorder %s2362_s29, 3 }
  0x3e   : > { %s2371_s26 = smov [#allocation5]   ;;  %p3095_p12 = scmp.eq.s32.totalorder %s2362_s29, 0 }
  0x3f   : > { %p2566_p11 = pnand %p1823_p2, %p385_p9  ;;  %s328_s16 = sshll.u32 %s2371_s26, 4  ;;  %s329_s16 = int_to_ptr.vmem [resolvable:$true] %s328_s16 }
  0x40   : > { %p3096_p13 = scmp.lt.s32.totalorder %s2362_s29, 2  ;;  %s2154_s11 = scalar_lea.hbm %s3050_s0, 1024 }
  0x41   : > { %s3094_s15 = scalar_select %p2566_p11, 1, 0 }
  0x42   : > { %p2574_p7 = pnand %p3096_p13, %p3095_p12  ;;  %p2155_p1 = scmp.ne.s32.totalorder %s3050_s0, %s2154_s11 }
  0x43   : > { %p2161_p5 = scmp.lt.u32.totalorder %s2154_s11, %s3050_s0 }
  0x44   : > { %p2156_p6 = pneg %p2574_p7 }
  0x46   : > { %p2157_p4 = pnand %p2156_p6, %p2155_p1 }
  0x48   : > { %p2158_p10 = pneg %p2157_p4 }
  0x4a   : > { %p2163_p2 = pnand %p2161_p5, %p2158_p10 }
  0x4c   : > { %2166 = shalt.err (!%p2163_p2)
}
  0x4d   : > { %s2167_s20 = scalar_lea.vmem %s329_s16, 1024  ;;  %s2174_s12 = scalar_lea.vmem %s329_s16, 2048 }
  0x4e   : > { %p2168_p9 = scmp.ne.s32.totalorder %s329_s16, %s2167_s20  ;;  %p2175_p3 = scmp.lt.s32.totalorder %s329_s16, %s329_s16 }
  0x4f   : > { %p2176_p8 = scmp.lt.s32.totalorder %s2174_s12, %s2167_s20 }
  0x50   : > { %p2170_p12 = pnand %p2168_p9, %p2156_p6 }
  0x51   : > { %p2177_p11 = por %p2176_p8, %p2175_p3 }
  0x52   : > { %p2171_p13 = pneg %p2170_p12 }
  0x54   : > { %p2178_p0 = pnand %p2177_p11, %p2171_p13 }
  0x56   : > { %2181 = shalt.err (!%p2178_p0)
}
  0x57   : > { %s2372_s19 = smov 64   ;;  %s2373_s11 = smov 4  }
  0x58   : > { %1952 = dma.hbm_to_vmem [thread:$0]  (!%p2574_p7), %s3050_s0, 1024, %s329_s16, [#allocation6], %s2372_s19, %s2372_s19, %s2373_s11  }
  0x59   : > { %s2182_s26 = scalar_lea.hbm %s2559_s10, 4096  ;;  %p3098_p6 = scmp.ne.s32.totalorder %s3092_s18, 0 }
  0x5a   : > { %p2183_p1 = scmp.ne.s32.totalorder %s2559_s10, %s2182_s26  ;;  %s2187_s12 = scalar_lea.hbm %s3054_s4, 8192 }
  0x5b   : > { %p3099_p4 = pneg %p3098_p6  ;;  %p2188_p0 = scmp.lt.u32.totalorder %s2559_s10, %s3054_s4 }
  0x5c   : > { %p2189_p11 = scmp.lt.u32.totalorder %s2187_s12, %s2182_s26  ;;  %p2191_p5 = scmp.lt.u32.totalorder %s2182_s26, %s2559_s10 }
  0x5d   : > { %p2185_p8 = pnand %p2183_p1, %p3099_p4 }
  0x5e   : > { %p2190_p10 = por %p2189_p11, %p2188_p0 }
  0x5f   : > { %p2186_p3 = pneg %p2185_p8 }
  0x60   : > { %p2192_p2 = por %p2191_p5, %p2190_p10 }
  0x62   : > { %p2193_p9 = pnand %p2192_p2, %p2186_p3 }
  0x64   : > { %2196 = shalt.err (!%p2193_p9)
}
  0x65   : > { %s2197_s16 = scalar_lea.vmem %s2562_s2, 4096  ;;  %p3100_p12 = pmov %p3099_p4 }
  0x66   : > { %p2198_p7 = scmp.ne.s32.totalorder %s2562_s2, %s2197_s16  ;;  %s2374_s23 = smov [#allocation10]  }
  0x67   : > { %s2202_s19 = sshll.u32 %s2374_s23, 4  ;;  %s2203_s19 = int_to_ptr.vmem [resolvable:$false] %s2202_s19 }
  0x68   : > { %p2200_p13 = pnand %p2198_p7, %p3100_p12  ;;  %s2204_s28 = scalar_lea.vmem %s2203_s19, 8192 }
  0x69   : > { %p2205_p4 = scmp.lt.s32.totalorder %s2562_s2, %s2203_s19  ;;  %p2206_p8 = scmp.lt.s32.totalorder %s2204_s28, %s2197_s16 }
  0x6a   : > { %p2201_p1 = pneg %p2200_p13 }
  0x6b   : > { %p2207_p0 = por %p2206_p8, %p2205_p4 }
  0x6d   : > { %p2208_p11 = pnand %p2207_p0, %p2201_p1 }
  0x6f   : > { %2211 = shalt.err (!%p2208_p11)
}
  0x70   : > { %s3101_s21 = smov 16   ;;  %s3102_s11 = smov 256  }
  0x71   : > { %1958 = dma.hbm_to_vmem [thread:$0]  (!%p3098_p6), %s2559_s10, 4096, %s2562_s2, %s2523_s8, %s3102_s11, %s3102_s11, %s3101_s21  }
  0x72   : > { %p3103_p3 = scmp.ne.s32.totalorder %s3094_s15, 0 }
  0x74   : > { %389 = sbr.rel (%p3103_p3) target bundleno = 827 (0x33b), region = 40 }
  0x7b   : > { %p3104_p10 = scmp.eq.s32.totalorder %s2457_s30, 0 }
  0x7d   : > { %2325 = dma.done.wait (%p3104_p10), [#allocation6], 1024   ;;  %p3105_p5 = pmov %p3104_p10 }
  0x7e   : > { %s400_s18 = sand.u32 1, %s2457_s30   ;;  %s2629_s17 = sand.u32 1, %s2346_s25  }
  0x7f   : > { %2327 = vsyncadd (%p3105_p5), [#allocation6], 4294966272  ;;  %s1825_s22 = sshll.u32 %s2629_s17, 8  ;;  %s401_s2 = scalar_lea.sflag [#allocation9], %s400_s18 }
  0x80   : > { %s2634_s8 = scalar_lea.vmem [#allocation8], %s1825_s22  ;;  %p3106_p6 = scmp.ne.s32.totalorder %s3086_s13, 0 }
  0x82   : > { %2329 = dma.done.wait (%p3106_p6), %s401_s2, 8192  }
  0x83   : > { %2331 = vsyncadd (%p3106_p6), %s401_s2, 4294959104  ;;  %v2375_v0 = vmov 0.0   ;;  %s1827_s15 = sshll.u32 %s2629_s17, 6  ;;  %s1828_s10 = sshll.u32 %s2629_s17, 4  ;;  %v2376_v1 = vmov 0   ;;  %v2752_v35 = vld [vmem:[%s3051_s1] sm:$0xff] }
  0x84   : > { %1053 = vst [vmem:[#allocation3] sm:$0xff] %v2375_v0  ;;  %1054 = vst [vmem:[#allocation3 + $0x8] sm:$0xff] %v2375_v0  ;;  %791 = vmatprep.mubr.bf16.mxu0 %v2376_v1  ;;  %904 = vmatprep.mubr.bf16.mxu1 %v2376_v1  ;;  %p485_p2 = scmp.lt.s32.totalorder %s2354_s27, 1  ;;  %s2646_s13 = scalar_lea.vmem [#allocation10], %s1825_s22  ;;  %v2757_v36 = vld [vmem:[%s3051_s1 + $0x8] sm:$0xff] }
  0x85   : > { %1055 = vst [vmem:[#allocation4] sm:$0xff] %v2375_v0  ;;  %1056 = vst [vmem:[#allocation4 + $0x8] sm:$0xff] %v2375_v0  ;;  %v2649_v2 = vld [vmem:[%s2646_s13] sm:$0xff]  ;;  %v2652_v3 = vld [vmem:[%s2646_s13 + $0x8] sm:$0xff]  ;;  %s2807_s11 = scalar_lea.vmem [#allocation11], %s1827_s15  ;;  %s2811_s22 = scalar_lea.vmem [#allocation12], %s1828_s10 }
  0x86   : > { %s486_s26 = scalar_select %p485_p2, %s2354_s27, 1  ;;  %3107 = vst [vmem:[#allocation24_spill] sm:$0xff] %v2649_v2  ;;  %3108 = vst [vmem:[#allocation25_spill] sm:$0xff] %v2652_v3  ;;  %v2655_v4 = vld [vmem:[%s2646_s13 + $0x10] sm:$0xff]  ;;  %v2658_v5 = vld [vmem:[%s2646_s13 + $0x18] sm:$0xff] }
  0x87   : > { %3109 = vst [vmem:[#allocation26_spill] sm:$0xff] %v2655_v4  ;;  %3110 = vst [vmem:[#allocation27_spill] sm:$0xff] %v2658_v5  ;;  %v2661_v6 = vld [vmem:[%s2646_s13 + $0x20] sm:$0xff]  ;;  %v2664_v7 = vld [vmem:[%s2646_s13 + $0x28] sm:$0xff]  ;;  %s2815_s2 = scalar_lea.vmem [#allocation14], %s1828_s10 }
  0x88   : > { %3111 = vst [vmem:[#allocation28_spill] sm:$0xff] %v2661_v6  ;;  %3112 = vst [vmem:[#allocation29_spill] sm:$0xff] %v2664_v7  ;;  %v2667_v8 = vld [vmem:[%s2646_s13 + $0x30] sm:$0xff]  ;;  %v2670_v9 = vld [vmem:[%s2646_s13 + $0x38] sm:$0xff]  ;;  %s1830_s20 = sshll.u32 %s486_s26, 2 }
  0x89   : > { %3113 = vst [vmem:[#allocation30_spill] sm:$0xff] %v2667_v8  ;;  %v2673_v10 = vld [vmem:[%s2646_s13 + $0x40] sm:$0xff]  ;;  %v2676_v11 = vld [vmem:[%s2646_s13 + $0x48] sm:$0xff]  ;;  %v2679_v12 = vld [vmem:[%s2646_s13 + $0x50] sm:$0xff]  ;;  %s488_s16 = scalar_lea.vmem %s3053_s3, %s1830_s20 }
  0x8a   : > { %v2682_v13 = vld [vmem:[%s2646_s13 + $0x58] sm:$0xff]  ;;  %v2685_v14 = vld [vmem:[%s2646_s13 + $0x60] sm:$0xff]  ;;  %v2688_v15 = vld [vmem:[%s2646_s13 + $0x68] sm:$0xff] }
  0x8b   : > { %v2691_v16 = vld [vmem:[%s2646_s13 + $0x70] sm:$0xff]  ;;  %v2694_v17 = vld [vmem:[%s2646_s13 + $0x78] sm:$0xff]  ;;  %v2697_v18 = vld [vmem:[%s2646_s13 + $0x80] sm:$0xff] }
  0x8c   : > { %v2700_v19 = vld [vmem:[%s2646_s13 + $0x88] sm:$0xff]  ;;  %v2703_v20 = vld [vmem:[%s2646_s13 + $0x90] sm:$0xff]  ;;  %v2706_v21 = vld [vmem:[%s2646_s13 + $0x98] sm:$0xff] }
  0x8d   : > { %v2709_v22 = vld [vmem:[%s2646_s13 + $0xa0] sm:$0xff]  ;;  %v2715_v23 = vld [vmem:[%s2646_s13 + $0xa8] sm:$0xff]  ;;  %v2718_v24 = vld [vmem:[%s2646_s13 + $0xb0] sm:$0xff] }
  0x8e   : > { %v2721_v25 = vld [vmem:[%s2646_s13 + $0xb8] sm:$0xff]  ;;  %v2724_v26 = vld [vmem:[%s2646_s13 + $0xc0] sm:$0xff]  ;;  %v2727_v27 = vld [vmem:[%s2646_s13 + $0xc8] sm:$0xff] }
  0x8f   : > { %v2730_v28 = vld [vmem:[%s2646_s13 + $0xd0] sm:$0xff]  ;;  %v2733_v29 = vld [vmem:[%s2646_s13 + $0xd8] sm:$0xff]  ;;  %v2736_v30 = vld [vmem:[%s2646_s13 + $0xe0] sm:$0xff] }
  0x90   : > { %v2739_v31 = vld [vmem:[%s2646_s13 + $0xe8] sm:$0xff]  ;;  %v2742_v32 = vld [vmem:[%s2646_s13 + $0xf0] sm:$0xff]  ;;  %v2745_v33 = vld [vmem:[%s2646_s13 + $0xf8] sm:$0xff] }
  0x91   : > { %v2747_v34 = vld [vmem:[%s488_s16] sm:$0xf]  ;;  %v2042_v37 = vld [vmem:[%s2634_s8 + $0x4] ss:$16 sps:$4 sm:$0xff]   ;;  %v2044_v38 = vld [vmem:[%s2634_s8 + $0xc] ss:$16 sps:$4 sm:$0xff]  }
  0x92   : > { %v2046_v39 = vld [vmem:[%s2634_s8] ss:$16 sps:$4 sm:$0xff]   ;;  %759 = vmatprep.subr.bf16.mxu0 %v2042_v37  ;;  %v2047_v40 = vld [vmem:[%s2634_s8 + $0x8] ss:$16 sps:$4 sm:$0xff]   ;;  %872 = vmatprep.subr.bf16.mxu1 %v2044_v38  ;;  %v2048_v41 = vld [vmem:[%s2634_s8 + $0x24] ss:$16 sps:$4 sm:$0xff]  }
  0x93   : > { %760 = vmatpush1.bf16.msra.mxu0 %v2046_v39  ;;  %873 = vmatpush1.bf16.msra.mxu1 %v2047_v40  ;;  %v2050_v42 = vld [vmem:[%s2634_s8 + $0x2c] ss:$16 sps:$4 sm:$0xff]   ;;  %v2052_v43 = vld [vmem:[%s2634_s8 + $0x20] ss:$16 sps:$4 sm:$0xff]   ;;  %v2053_v44 = vld [vmem:[%s2634_s8 + $0x28] ss:$16 sps:$4 sm:$0xff]  }
  0x94   : > { %761 = vmatprep.subr.bf16.mxu0 %v2048_v41  ;;  %v2054_v45 = vld [vmem:[%s2634_s8 + $0x44] ss:$16 sps:$4 sm:$0xff]   ;;  %874 = vmatprep.subr.bf16.mxu1 %v2050_v42  ;;  %v2056_v46 = vld [vmem:[%s2634_s8 + $0x4c] ss:$16 sps:$4 sm:$0xff]   ;;  %v2058_v47 = vld [vmem:[%s2634_s8 + $0x40] ss:$16 sps:$4 sm:$0xff]  }
  0x95   : > { %v2059_v48 = vld [vmem:[%s2634_s8 + $0x48] ss:$16 sps:$4 sm:$0xff]   ;;  %v2060_v49 = vld [vmem:[%s2634_s8 + $0x64] ss:$16 sps:$4 sm:$0xff]   ;;  %v2062_v50 = vld [vmem:[%s2634_s8 + $0x6c] ss:$16 sps:$4 sm:$0xff]  }
  0x96   : > { %v2064_v51 = vld [vmem:[%s2634_s8 + $0x60] ss:$16 sps:$4 sm:$0xff]   ;;  %v2065_v52 = vld [vmem:[%s2634_s8 + $0x68] ss:$16 sps:$4 sm:$0xff]   ;;  %v2066_v53 = vld [vmem:[%s2634_s8 + $0x84] ss:$16 sps:$4 sm:$0xff]  }
  0x97   : > { %762 = vmatpush1.bf16.msra.mxu0 %v2052_v43  ;;  %875 = vmatpush1.bf16.msra.mxu1 %v2053_v44  ;;  %v2068_v54 = vld [vmem:[%s2634_s8 + $0x8c] ss:$16 sps:$4 sm:$0xff]   ;;  %v2070_v55 = vld [vmem:[%s2634_s8 + $0x80] ss:$16 sps:$4 sm:$0xff]   ;;  %v2071_v56 = vld [vmem:[%s2634_s8 + $0x88] ss:$16 sps:$4 sm:$0xff]  }
  0x98   : > { %763 = vmatprep.subr.bf16.mxu0 %v2054_v45  ;;  %876 = vmatprep.subr.bf16.mxu1 %v2056_v46  ;;  %v2072_v57 = vld [vmem:[%s2634_s8 + $0xa4] ss:$16 sps:$4 sm:$0xff]   ;;  %v2074_v58 = vld [vmem:[%s2634_s8 + $0xac] ss:$16 sps:$4 sm:$0xff]   ;;  %v2076_v59 = vld [vmem:[%s2634_s8 + $0xa0] ss:$16 sps:$4 sm:$0xff]  }
  0x99   : > { %v2077_v60 = vld [vmem:[%s2634_s8 + $0xa8] ss:$16 sps:$4 sm:$0xff]   ;;  %v2078_v61 = vld [vmem:[%s2634_s8 + $0xc4] ss:$16 sps:$4 sm:$0xff]   ;;  %v2080_v62 = vld [vmem:[%s2634_s8 + $0xcc] ss:$16 sps:$4 sm:$0xff]  }
  0x9a   : > { %v2082_v63 = vld [vmem:[%s2634_s8 + $0xc0] ss:$16 sps:$4 sm:$0xff]   ;;  %v2083_v0 = vld [vmem:[%s2634_s8 + $0xc8] ss:$16 sps:$4 sm:$0xff]   ;;  %v2084_v37 = vld [vmem:[%s2634_s8 + $0xe4] ss:$16 sps:$4 sm:$0xff]  }
  0x9b   : > { %764 = vmatpush1.bf16.msra.mxu0 %v2058_v47  ;;  %877 = vmatpush1.bf16.msra.mxu1 %v2059_v48  ;;  %v2086_v38 = vld [vmem:[%s2634_s8 + $0xec] ss:$16 sps:$4 sm:$0xff]   ;;  %v2088_v39 = vld [vmem:[%s2634_s8 + $0xe0] ss:$16 sps:$4 sm:$0xff]   ;;  %v2089_v40 = vld [vmem:[%s2634_s8 + $0xe8] ss:$16 sps:$4 sm:$0xff]  }
  0x9c   : > { %765 = vmatprep.subr.bf16.mxu0 %v2060_v49  ;;  %878 = vmatprep.subr.bf16.mxu1 %v2062_v50  ;;  %v2090_v41 = vld [vmem:[#allocation5] sm:$0xff]   ;;  %v2091_v42 = vld [vmem:[#allocation5 + $0x8] sm:$0xff]   ;;  %v2092_v43 = vld [vmem:[#allocation5 + $0x10] sm:$0xff]   ;;  %s2817_s8 = smov 0  }
  0x9d   : > { %v2093_v44 = vld [vmem:[#allocation5 + $0x18] sm:$0xff]   ;;  %v2094_v45 = vld [vmem:[#allocation5 + $0x20] sm:$0xff]   ;;  %v2095_v46 = vld [vmem:[#allocation5 + $0x28] sm:$0xff]  }
  0x9e   : > { %v2096_v47 = vld [vmem:[#allocation5 + $0x30] sm:$0xff]   ;;  %v2097_v48 = vld [vmem:[#allocation5 + $0x38] sm:$0xff]  }
  0x9f   : > { %766 = vmatpush1.bf16.msra.mxu0 %v2064_v51  ;;  %879 = vmatpush1.bf16.msra.mxu1 %v2065_v52 }
  0xa0   : > { %767 = vmatprep.subr.bf16.mxu0 %v2066_v53  ;;  %880 = vmatprep.subr.bf16.mxu1 %v2068_v54 }
  0xa3   : > { %768 = vmatpush1.bf16.msra.mxu0 %v2070_v55  ;;  %881 = vmatpush1.bf16.msra.mxu1 %v2071_v56 }
  0xa4   : > { %769 = vmatprep.subr.bf16.mxu0 %v2072_v57  ;;  %882 = vmatprep.subr.bf16.mxu1 %v2074_v58 }
  0xa7   : > { %770 = vmatpush1.bf16.msra.mxu0 %v2076_v59  ;;  %883 = vmatpush1.bf16.msra.mxu1 %v2077_v60 }
  0xa8   : > { %771 = vmatprep.subr.bf16.mxu0 %v2078_v61  ;;  %884 = vmatprep.subr.bf16.mxu1 %v2080_v62 }
  0xab   : > { %772 = vmatpush1.bf16.msra.mxu0 %v2082_v63  ;;  %885 = vmatpush1.bf16.msra.mxu1 %v2083_v0 }
  0xac   : > { %773 = vmatprep.subr.bf16.mxu0 %v2084_v37  ;;  %886 = vmatprep.subr.bf16.mxu1 %v2086_v38 }
  0xaf   : > { %774 = vmatpush1.bf16.msra.mxu0 %v2088_v39  ;;  %887 = vmatpush1.bf16.msra.mxu1 %v2089_v40 }
  0xb2   : > { %792 = vmatmul.mubr.bf16.vlgmr.msra.gmra.mrb[0].mxu0 %v2090_v41  ;;  %905 = vmatmul.mubr.bf16.vlgmr.msra.gmra.mrb[0].mxu1 %v2090_v41 }
  0xb3   : > { %801 = vmatprep.mubr.bf16.mxu0 %v2376_v1  ;;  %914 = vmatprep.mubr.bf16.mxu1 %v2376_v1 }
  0xba   : > { %802 = vmatmul.mubr.bf16.gmra.mrb[4].mxu0 %v2091_v42  ;;  %915 = vmatmul.mubr.bf16.gmra.mrb[4].mxu1 %v2091_v42 }
  0xbb   : > { %811 = vmatprep.mubr.bf16.mxu0 %v2376_v1  ;;  %924 = vmatprep.mubr.bf16.mxu1 %v2376_v1 }
  0xc2   : > { %812 = vmatmul.mubr.bf16.gmra.mrb[8].mxu0 %v2092_v43  ;;  %925 = vmatmul.mubr.bf16.gmra.mrb[8].mxu1 %v2092_v43 }
  0xc3   : > { %821 = vmatprep.mubr.bf16.mxu0 %v2376_v1  ;;  %934 = vmatprep.mubr.bf16.mxu1 %v2376_v1 }
  0xca   : > { %822 = vmatmul.mubr.bf16.gmra.mrb[12].mxu0 %v2093_v44  ;;  %935 = vmatmul.mubr.bf16.gmra.mrb[12].mxu1 %v2093_v44 }
  0xcb   : > { %831 = vmatprep.mubr.bf16.mxu0 %v2376_v1  ;;  %944 = vmatprep.mubr.bf16.mxu1 %v2376_v1 }
  0xd2   : > { %832 = vmatmul.mubr.bf16.gmra.mrb[16].mxu0 %v2094_v45  ;;  %945 = vmatmul.mubr.bf16.gmra.mrb[16].mxu1 %v2094_v45 }
  0xd3   : > { %841 = vmatprep.mubr.bf16.mxu0 %v2376_v1  ;;  %954 = vmatprep.mubr.bf16.mxu1 %v2376_v1 }
  0xda   : > { %842 = vmatmul.mubr.bf16.gmra.mrb[20].mxu0 %v2095_v46  ;;  %955 = vmatmul.mubr.bf16.gmra.mrb[20].mxu1 %v2095_v46 }
  0xdb   : > { %851 = vmatprep.mubr.bf16.mxu0 %v2376_v1  ;;  %964 = vmatprep.mubr.bf16.mxu1 %v2376_v1 }
  0xe2   : > { %852 = vmatmul.mubr.bf16.gmra.mrb[24].mxu0 %v2096_v47  ;;  %965 = vmatmul.mubr.bf16.gmra.mrb[24].mxu1 %v2096_v47 }
  0xe3   : > { %861 = vmatprep.mubr.bf16.mxu0 %v2376_v1  ;;  %974 = vmatprep.mubr.bf16.mxu1 %v2376_v1 }
  0xea   : > { %862 = vmatmul.mubr.bf16.gmra.mrb[28].mxu0 %v2097_v48  ;;  %975 = vmatmul.mubr.bf16.gmra.mrb[28].mxu1 %v2097_v48 }
 0x185   : > { %v793_v49 = vpop.f32.mrb[0].mxu0  ;;  %v906_v50 = vpop.f32.mrb[0].mxu1 }
 0x186   : > { %v795_v51 = vpop.f32.mrb[1].mxu0  ;;  %v908_v52 = vpop.f32.mrb[1].mxu1 }
 0x187   : > { %v797_v53 = vpop.f32.mrb[2].mxu0  ;;  %v910_v55 = vpop.f32.mrb[2].mxu1 }
 0x188   : > { %v985_v54 = vpack.c.bf16 %v797_v53, %v793_v49  ;;  %v799_v56 = vpop.f32.mrb[3].mxu0  ;;  %v987_v57 = vpack.c.bf16 %v910_v55, %v906_v50  ;;  %v912_v59 = vpop.f32.mrb[3].mxu1 }
 0x189   : > { %v986_v58 = vpack.c.bf16 %v799_v56, %v795_v51  ;;  %v988_v60 = vpack.c.bf16 %v912_v59, %v908_v52 }
 0x18a   : > { %1017 = vst [vmem:[#allocation2] sm:$0xff] %v985_v54  ;;  %1019 = vst [vmem:[#allocation2 + $0x10] sm:$0xff] %v987_v57 }
 0x18b   : > { %1018 = vst [vmem:[#allocation2 + $0x8] sm:$0xff] %v986_v58  ;;  %1020 = vst [vmem:[#allocation2 + $0x18] sm:$0xff] %v988_v60 }
 0x18d   : > { %v803_v1 = vpop.f32.mrb[4].mxu0  ;;  %v916_v61 = vpop.f32.mrb[4].mxu1 }
 0x18e   : > { %v805_v62 = vpop.f32.mrb[5].mxu0  ;;  %v918_v63 = vpop.f32.mrb[5].mxu1 }
 0x18f   : > { %v807_v0 = vpop.f32.mrb[6].mxu0  ;;  %v920_v38 = vpop.f32.mrb[6].mxu1 }
 0x190   : > { %v989_v37 = vpack.c.bf16 %v807_v0, %v803_v1  ;;  %v809_v39 = vpop.f32.mrb[7].mxu0  ;;  %v991_v40 = vpack.c.bf16 %v920_v38, %v916_v61  ;;  %v922_v42 = vpop.f32.mrb[7].mxu1 }
 0x191   : > { %v990_v41 = vpack.c.bf16 %v809_v39, %v805_v62  ;;  %v992_v43 = vpack.c.bf16 %v922_v42, %v918_v63 }
 0x192   : > { %1021 = vst [vmem:[#allocation2 + $0x20] sm:$0xff] %v989_v37  ;;  %1023 = vst [vmem:[#allocation2 + $0x30] sm:$0xff] %v991_v40 }
 0x193   : > { %1022 = vst [vmem:[#allocation2 + $0x28] sm:$0xff] %v990_v41  ;;  %1024 = vst [vmem:[#allocation2 + $0x38] sm:$0xff] %v992_v43 }
 0x195   : > { %v813_v44 = vpop.f32.mrb[8].mxu0  ;;  %v926_v45 = vpop.f32.mrb[8].mxu1 }
 0x196   : > { %v815_v46 = vpop.f32.mrb[9].mxu0  ;;  %v928_v47 = vpop.f32.mrb[9].mxu1 }
 0x197   : > { %v817_v48 = vpop.f32.mrb[10].mxu0  ;;  %v930_v50 = vpop.f32.mrb[10].mxu1 }
 0x198   : > { %v993_v49 = vpack.c.bf16 %v817_v48, %v813_v44  ;;  %v819_v51 = vpop.f32.mrb[11].mxu0  ;;  %v995_v52 = vpack.c.bf16 %v930_v50, %v926_v45  ;;  %v932_v54 = vpop.f32.mrb[11].mxu1 }
 0x199   : > { %v994_v53 = vpack.c.bf16 %v819_v51, %v815_v46  ;;  %v996_v55 = vpack.c.bf16 %v932_v54, %v928_v47 }
 0x19a   : > { %1025 = vst [vmem:[#allocation2 + $0x40] sm:$0xff] %v993_v49  ;;  %1027 = vst [vmem:[#allocation2 + $0x50] sm:$0xff] %v995_v52 }
 0x19b   : > { %1026 = vst [vmem:[#allocation2 + $0x48] sm:$0xff] %v994_v53  ;;  %1028 = vst [vmem:[#allocation2 + $0x58] sm:$0xff] %v996_v55 }
 0x19d   : > { %v823_v56 = vpop.f32.mrb[12].mxu0  ;;  %v936_v57 = vpop.f32.mrb[12].mxu1 }
 0x19e   : > { %v825_v58 = vpop.f32.mrb[13].mxu0  ;;  %v938_v59 = vpop.f32.mrb[13].mxu1 }
 0x19f   : > { %v827_v60 = vpop.f32.mrb[14].mxu0  ;;  %v940_v61 = vpop.f32.mrb[14].mxu1 }
 0x1a0   : > { %v997_v1 = vpack.c.bf16 %v827_v60, %v823_v56  ;;  %v829_v62 = vpop.f32.mrb[15].mxu0  ;;  %v999_v63 = vpack.c.bf16 %v940_v61, %v936_v57  ;;  %v942_v37 = vpop.f32.mrb[15].mxu1 }
 0x1a1   : > { %v998_v0 = vpack.c.bf16 %v829_v62, %v825_v58  ;;  %v1000_v38 = vpack.c.bf16 %v942_v37, %v938_v59 }
 0x1a2   : > { %1029 = vst [vmem:[#allocation2 + $0x60] sm:$0xff] %v997_v1  ;;  %1031 = vst [vmem:[#allocation2 + $0x70] sm:$0xff] %v999_v63 }
 0x1a3   : > { %1030 = vst [vmem:[#allocation2 + $0x68] sm:$0xff] %v998_v0  ;;  %1032 = vst [vmem:[#allocation2 + $0x78] sm:$0xff] %v1000_v38 }
 0x1a5   : > { %v833_v39 = vpop.f32.mrb[16].mxu0  ;;  %v946_v40 = vpop.f32.mrb[16].mxu1 }
 0x1a6   : > { %v835_v41 = vpop.f32.mrb[17].mxu0  ;;  %v948_v42 = vpop.f32.mrb[17].mxu1 }
 0x1a7   : > { %v837_v43 = vpop.f32.mrb[18].mxu0  ;;  %v950_v45 = vpop.f32.mrb[18].mxu1 }
 0x1a8   : > { %v1001_v44 = vpack.c.bf16 %v837_v43, %v833_v39  ;;  %v839_v46 = vpop.f32.mrb[19].mxu0  ;;  %v1003_v47 = vpack.c.bf16 %v950_v45, %v946_v40  ;;  %v952_v49 = vpop.f32.mrb[19].mxu1 }
 0x1a9   : > { %v1002_v48 = vpack.c.bf16 %v839_v46, %v835_v41  ;;  %v1004_v50 = vpack.c.bf16 %v952_v49, %v948_v42 }
 0x1aa   : > { %1033 = vst [vmem:[#allocation2 + $0x80] sm:$0xff] %v1001_v44  ;;  %1035 = vst [vmem:[#allocation2 + $0x90] sm:$0xff] %v1003_v47 }
 0x1ab   : > { %1034 = vst [vmem:[#allocation2 + $0x88] sm:$0xff] %v1002_v48  ;;  %1036 = vst [vmem:[#allocation2 + $0x98] sm:$0xff] %v1004_v50 }
 0x1ad   : > { %v843_v51 = vpop.f32.mrb[20].mxu0  ;;  %v956_v52 = vpop.f32.mrb[20].mxu1 }
 0x1ae   : > { %v845_v53 = vpop.f32.mrb[21].mxu0  ;;  %v958_v54 = vpop.f32.mrb[21].mxu1 }
 0x1af   : > { %v847_v55 = vpop.f32.mrb[22].mxu0  ;;  %v960_v57 = vpop.f32.mrb[22].mxu1 }
 0x1b0   : > { %v1005_v56 = vpack.c.bf16 %v847_v55, %v843_v51  ;;  %v849_v58 = vpop.f32.mrb[23].mxu0  ;;  %v1007_v59 = vpack.c.bf16 %v960_v57, %v956_v52  ;;  %v962_v1 = vpop.f32.mrb[23].mxu1 }
 0x1b1   : > { %v1006_v60 = vpack.c.bf16 %v849_v58, %v845_v53  ;;  %v1008_v61 = vpack.c.bf16 %v962_v1, %v958_v54 }
 0x1b2   : > { %1037 = vst [vmem:[#allocation2 + $0xa0] sm:$0xff] %v1005_v56  ;;  %1039 = vst [vmem:[#allocation2 + $0xb0] sm:$0xff] %v1007_v59 }
 0x1b3   : > { %1038 = vst [vmem:[#allocation2 + $0xa8] sm:$0xff] %v1006_v60  ;;  %1040 = vst [vmem:[#allocation2 + $0xb8] sm:$0xff] %v1008_v61 }
 0x1b5   : > { %v853_v62 = vpop.f32.mrb[24].mxu0  ;;  %v966_v63 = vpop.f32.mrb[24].mxu1 }
 0x1b6   : > { %v855_v0 = vpop.f32.mrb[25].mxu0  ;;  %v968_v37 = vpop.f32.mrb[25].mxu1 }
 0x1b7   : > { %v857_v38 = vpop.f32.mrb[26].mxu0  ;;  %v970_v40 = vpop.f32.mrb[26].mxu1 }
 0x1b8   : > { %v1009_v39 = vpack.c.bf16 %v857_v38, %v853_v62  ;;  %v859_v41 = vpop.f32.mrb[27].mxu0  ;;  %v1011_v42 = vpack.c.bf16 %v970_v40, %v966_v63  ;;  %v972_v44 = vpop.f32.mrb[27].mxu1 }
 0x1b9   : > { %v1010_v43 = vpack.c.bf16 %v859_v41, %v855_v0  ;;  %v1012_v45 = vpack.c.bf16 %v972_v44, %v968_v37 }
 0x1ba   : > { %1041 = vst [vmem:[#allocation2 + $0xc0] sm:$0xff] %v1009_v39  ;;  %1043 = vst [vmem:[#allocation2 + $0xd0] sm:$0xff] %v1011_v42 }
 0x1bb   : > { %1042 = vst [vmem:[#allocation2 + $0xc8] sm:$0xff] %v1010_v43  ;;  %1044 = vst [vmem:[#allocation2 + $0xd8] sm:$0xff] %v1012_v45 }
 0x1bd   : > { %v863_v46 = vpop.f32.mrb[28].mxu0  ;;  %v976_v47 = vpop.f32.mrb[28].mxu1 }
 0x1be   : > { %v865_v48 = vpop.f32.mrb[29].mxu0  ;;  %v978_v49 = vpop.f32.mrb[29].mxu1 }
 0x1bf   : > { %v867_v50 = vpop.f32.mrb[30].mxu0  ;;  %v980_v52 = vpop.f32.mrb[30].mxu1 }
 0x1c0   : > { %v1013_v51 = vpack.c.bf16 %v867_v50, %v863_v46  ;;  %v869_v53 = vpop.f32.mrb[31].mxu0  ;;  %v1015_v54 = vpack.c.bf16 %v980_v52, %v976_v47  ;;  %v982_v56 = vpop.f32.mrb[31].mxu1 }
 0x1c1   : > { %v1014_v55 = vpack.c.bf16 %v869_v53, %v865_v48  ;;  %v1016_v57 = vpack.c.bf16 %v982_v56, %v978_v49 }
 0x1c2   : > { %1045 = vst [vmem:[#allocation2 + $0xe0] sm:$0xff] %v1013_v51  ;;  %1047 = vst [vmem:[#allocation2 + $0xf0] sm:$0xff] %v1015_v54 }
 0x1c3   : > { %1046 = vst [vmem:[#allocation2 + $0xe8] sm:$0xff] %v1014_v55  ;;  %1048 = vst [vmem:[#allocation2 + $0xf8] sm:$0xff] %v1016_v57 }
 0x1c4 LB: >> { %v3114_v8 = vld [vmem:[#allocation30_spill] sm:$0xff]  ;;  %v3115_v7 = vld [vmem:[#allocation29_spill] sm:$0xff]  ;;  %v3116_v6 = vld [vmem:[#allocation28_spill] sm:$0xff]  ;;  %s1871_s15 = sshll.u32 %s2366_s8, 1  ;;  %v1881_v37 = vcombine.high %v2673_v10, %v2679_v12  ;;  %v1883_v38 = vcombine.high %v2676_v11, %v2682_v13  ;;  %v2377_v39 = vmov 0   ;;  %v1880_v40 = vcombine.low %v2673_v10, %v2679_v12  ;;  %s2366_s8 = sphi %s2817_s8, %s1097_s8  }
 0x1c5   : >> { %v3117_v5 = vld [vmem:[#allocation27_spill] sm:$0xff]  ;;  %v3118_v4 = vld [vmem:[#allocation26_spill] sm:$0xff]  ;;  %v3119_v3 = vld [vmem:[#allocation25_spill] sm:$0xff]  ;;  %v1877_v1 = vcombine.high %v3116_v6, %v3114_v8  ;;  %v1879_v62 = vcombine.high %v3115_v7, %v2670_v9  ;;  %v1876_v63 = vcombine.low %v3116_v6, %v3114_v8  ;;  %v1878_v0 = vcombine.low %v3115_v7, %v2670_v9  ;;  %s1099_s10 = ssub.s32 7, %s1871_s15  ;;  %1297 = vmatprep.mubr.bf16.mxu0 %v2377_v39 }
 0x1c6   : >> { %v3120_v2 = vld [vmem:[#allocation24_spill] sm:$0xff]  ;;  %v1875_v60 = vcombine.high %v3119_v3, %v3117_v5  ;;  %v1874_v61 = vcombine.low %v3119_v3, %v3117_v5  ;;  %s1100_s26 = smul.u32 %s2354_s27, %s1099_s10  ;;  %1340 = vmatprep.mubr.bf16.mxu1 %v2377_v39  ;;  %v1882_v41 = vcombine.low %v2676_v11, %v2682_v13  ;;  %v1885_v43 = vcombine.high %v2685_v14, %v2691_v16 }
 0x1c7   : >> { %v1873_v58 = vcombine.high %v3120_v2, %v3118_v4  ;;  %v1872_v59 = vcombine.low %v3120_v2, %v3118_v4  ;;  %v1887_v44 = vcombine.high %v2688_v15, %v2694_v17  ;;  %2098 = vset.pattern.permute.xlu0 %v2377_v39  ;;  %v2378_v45 = vmov 0.0  }
 0x1c8   : >> { %1308 = vmatprep.subr.bf16.mxu1 %v1875_v60  ;;  %s2845_s13 = sadd.s32 %s2366_s8, %s1100_s26  ;;  %v1884_v48 = vcombine.low %v2685_v14, %v2691_v16  ;;  %v1886_v49 = vcombine.low %v2688_v15, %v2694_v17  ;;  %v1889_v51 = vcombine.high %v2697_v18, %v2703_v20  ;;  %v1891_v52 = vcombine.high %v2700_v19, %v2706_v21  ;;  %s1097_s8 = sadd.s32 1, %s2366_s8  }
 0x1c9   : >> { %1265 = vmatprep.subr.bf16.mxu0 %v1873_v58  ;;  %1309 = vmatpush1.bf16.msra.mxu1 %v1874_v61  ;;  %v1442_v42 = vstv %s2845_s13  ;;  %v1888_v53 = vcombine.low %v2697_v18, %v2703_v20  ;;  %v1890_v54 = vcombine.low %v2700_v19, %v2706_v21  ;;  %v1893_v55 = vcombine.high %v2709_v22, %v2718_v24  ;;  %s1924_s20 = sshll.u32 %s2845_s13, 5  ;;  %s1927_s12 = sshll.u32 %s2845_s13, 3 }
 0x1ca   : >> { %1266 = vmatpush1.bf16.msra.mxu0 %v1872_v59  ;;  %1310 = vmatprep.subr.bf16.mxu1 %v1879_v62  ;;  %vm1443_vm0 = vcmp.gt.s32.totalorder %v2752_v35, %v1442_v42  ;;  %vm1444_vm1 = vcmp.gt.s32.totalorder %v2757_v36, %v1442_v42  ;;  %v1895_v56 = vcombine.high %v2715_v23, %v2721_v25  ;;  %s1353_s9 = scalar_lea.vmem [#allocation2], %s1924_s20  ;;  %s1487_s16 = scalar_lea.vmem %s2807_s11, %s1927_s12 [#allocation11] }
 0x1cb   : >> { %1267 = vmatprep.subr.bf16.mxu0 %v1877_v1  ;;  %v1906_v46 = vsel %vm1443_vm0, 1.0, %v2378_v45  ;;  %v1907_v47 = vsel %vm1444_vm1, 1.0, %v2378_v45  ;;  %v1892_v57 = vcombine.low %v2709_v22, %v2718_v24  ;;  %v1894_v58 = vcombine.low %v2715_v23, %v2721_v25  ;;  %v1355_v45 = vld [vmem:[%s1353_s9 + $0x8] sm:$0xff]  ;;  %p1094_p9 = scmp.ge.s32.totalorder %s1097_s8, 8  }
 0x1cc   : >> { %v2099_v50 = vpack.i.bf16 %v1907_v47, %v1906_v46  ;;  %v1897_v59 = vcombine.high %v2724_v26, %v2730_v28  ;;  %v1899_v60 = vcombine.high %v2727_v27, %v2733_v29  ;;  %v1896_v1 = vcombine.low %v2724_v26, %v2730_v28  ;;  %v1357_v46 = vld [vmem:[%s1353_s9 + $0x18] sm:$0xff]  ;;  %s1928_s23 = sshll.u32 (%p1094_p9), %s2354_s27, 8  ;;  %s1552_s19 = sshll.u32 (%p1094_p9), %s2811_s22, 4  ;;  %s2925_s19 = int_to_ptr.vmem [resolvable:$true] %s1552_s19 }
 0x1cd   : >> { %1311 = vmatpush1.bf16.msra.mxu1 %v1878_v0  ;;  %v1898_v61 = vcombine.low %v2727_v27, %v2733_v29  ;;  %v1901_v62 = vcombine.high %v2736_v30, %v2742_v32  ;;  %v1900_v0 = vcombine.low %v2736_v30, %v2742_v32  ;;  %v1902_v39 = vcombine.low %v2739_v31, %v2745_v33  ;;  %s2923_s8 = scalar_lea.hbm (%p1094_p9), %s3056_s6, %s1928_s23  ;;  %s2930_s26 = scalar_lea.hbm (%p1094_p9), %s3057_s7, %s1928_s23 }
 0x1ce   : >> { %1268 = vmatpush1.bf16.msra.mxu0 %v1876_v63  ;;  %1312 = vmatprep.subr.bf16.mxu1 %v1883_v38  ;;  %v1903_v63 = vcombine.high %v2739_v31, %v2745_v33  ;;  %v2894_v38 = vld [vmem:[#allocation3 + $0x8] sm:$0xff]  ;;  %s2934_s13 = scalar_lea.sflag (%p1094_p9), [#allocation13], %s400_s18  ;;  %p3121_p12 = scmp.ne.s32.totalorder (%p1094_p9), %s3087_s14, 0 }
 0x1cf   : >> { %1269 = vmatprep.subr.bf16.mxu0 %v1881_v37  ;;  %2100 = vperm.xlu0 %2098, %v2099_v50   ;;  %v2892_v37 = vld [vmem:[#allocation3] sm:$0xff]  ;;  %v1359_v50 = vunpack.c.l.bf16 %v1355_v45  ;;  %s2379_s20 = smov (%p1094_p9), [#allocation12]  }
 0x1d1   : >> { %1313 = vmatpush1.bf16.msra.mxu1 %v1882_v41  ;;  %v1375_v41 = vlaneseq }
 0x1d2   : >> { %1270 = vmatpush1.bf16.msra.mxu0 %v1880_v40  ;;  %1314 = vmatprep.subr.bf16.mxu1 %v1887_v44  ;;  %v1104_v40 = vpack.c.bf16 %v2894_v38, %v2892_v37 }
 0x1d3   : >> { %1271 = vmatprep.subr.bf16.mxu0 %v1885_v43  ;;  %v1376_v42 = vshrl.u32 %v1375_v41, 7  ;;  %v1354_v43 = vld [vmem:[%s1353_s9] sm:$0xff] }
 0x1d5   : >> { %1315 = vmatpush1.bf16.msra.mxu1 %v1886_v49  ;;  %v1377_v44 = vsub.s32 0, %v1376_v42  ;;  %v1381_v47 = vsub.s32 1, %v1376_v42  ;;  %v1358_v49 = vunpack.c.l.bf16 %v1354_v43  ;;  %v1385_v3 = vsub.s32 2, %v1376_v42 }
 0x1d6   : >> { %1272 = vmatpush1.bf16.msra.mxu0 %v1884_v48  ;;  %1316 = vmatprep.subr.bf16.mxu1 %v1891_v52  ;;  %v1389_v48 = vsub.s32 3, %v1376_v42 }
 0x1d7   : >> { %1273 = vmatprep.subr.bf16.mxu0 %v1889_v51  ;;  %v1361_v51 = vunpack.c.l.bf16 %v1357_v46  ;;  %v1378_v52 = vrot.slane %v2747_v34, %v1377_v44 }
 0x1d9   : >> { %1317 = vmatpush1.bf16.msra.mxu1 %v1890_v54 }
 0x1da   : >> { %1274 = vmatpush1.bf16.msra.mxu0 %v1888_v53  ;;  %1318 = vmatprep.subr.bf16.mxu1 %v1895_v56  ;;  %v1362_v53 = vunpack.c.h.bf16 %v1354_v43  ;;  %v1363_v56 = vunpack.c.h.bf16 %v1355_v45 }
 0x1db   : >> { %1275 = vmatprep.subr.bf16.mxu0 %v1893_v55  ;;  %v1382_v55 = vrot.slane %v2747_v34, %v1381_v47 }
 0x1dd   : >> { %1319 = vmatpush1.bf16.msra.mxu1 %v1894_v58  ;;  %v1356_v58 = vld [vmem:[%s1353_s9 + $0x10] sm:$0xff]  ;;  %s2216_s9 = sshll.u32 (%p1094_p9), %s2379_s20, 4  ;;  %s2217_s9 = int_to_ptr.vmem [resolvable:$false] %s2216_s9 }
 0x1de   : >> { %1276 = vmatpush1.bf16.msra.mxu0 %v1892_v57  ;;  %1320 = vmatprep.subr.bf16.mxu1 %v1899_v60  ;;  %v1360_v43 = vunpack.c.l.bf16 %v1356_v58  ;;  %s2218_s12 = scalar_lea.vmem (%p1094_p9), %s2217_s9, 512  ;;  %p2219_p4 = scmp.lt.s32.totalorder (%p1094_p9), %s2925_s19, %s2217_s9 }
 0x1df   : >> { %1277 = vmatprep.subr.bf16.mxu0 %v1897_v59  ;;  %v1390_v59 = vrot.slane %v2747_v34, %v1389_v48  ;;  %v1364_v48 = vunpack.c.h.bf16 %v1356_v58 }
 0x1e1   : >> { %1321 = vmatpush1.bf16.msra.mxu1 %v1898_v61 }
 0x1e2   : >> { %1278 = vmatpush1.bf16.msra.mxu0 %v1896_v1  ;;  %1322 = vmatprep.subr.bf16.mxu1 %v1903_v63 }
 0x1e3   : >> { %1279 = vmatprep.subr.bf16.mxu0 %v1901_v62  ;;  %v1365_v62 = vunpack.c.h.bf16 %v1357_v46 }
 0x1e5   : >> { %1323 = vmatpush1.bf16.msra.mxu1 %v1902_v39 }
 0x1e6   : >> { %1280 = vmatpush1.bf16.msra.mxu0 %v1900_v0 }
 0x1e8   : >> { %1341 = vmatmul.mubr.bf16.vlgmr.msra.gmra.mrb[0].mxu1 %v1104_v40 }
 0x1e9   : >> { %1298 = vmatmul.mubr.bf16.vlgmr.msra.gmra.mrb[0].mxu0 %v1104_v40 }
 0x2bb   : >> { %v1342_v57 = vpop.f32.mrb[0].mxu1 }
 0x2bc   : >> { %v1299_v54 = vpop.f32.mrb[0].mxu0  ;;  %v1344_v61 = vpop.f32.mrb[1].mxu1 }
 0x2bd   : >> { %v1366_v60 = vadd.f32 %v1358_v49, %v1299_v54  ;;  %v1301_v1 = vpop.f32.mrb[1].mxu0  ;;  %v1369_v39 = vadd.f32 %v1361_v51, %v1344_v61  ;;  %v1346_v40 = vpop.f32.mrb[2].mxu1  ;;  %v1386_v51 = vrot.slane %v2747_v34, %v1385_v3  ;;  %v1429_v61 = vld [vmem:[#allocation4] sm:$0xff] }
 0x2be   : >> { %v1367_v63 = vadd.f32 %v1359_v50, %v1301_v1  ;;  %v1303_v0 = vpop.f32.mrb[2].mxu0  ;;  %v1348_v4 = vpop.f32.mrb[3].mxu1  ;;  %v1368_v50 = vadd.f32 %v1360_v43, %v1342_v57  ;;  %v1372_v42 = vadd.f32 %v1364_v48, %v1346_v40 }
 0x2bf   : >> { %v1395_v41 = vadd.f32 %v1378_v52, %v1366_v60  ;;  %v1370_v2 = vadd.f32 %v1362_v53, %v1303_v0  ;;  %v1305_v44 = vpop.f32.mrb[3].mxu0  ;;  %v1398_v5 = vadd.f32 %v1390_v59, %v1369_v39  ;;  %v1373_v49 = vadd.f32 %v1365_v62, %v1348_v4  ;;  %v1430_v0 = vld [vmem:[#allocation4 + $0x8] sm:$0xff]  ;;  %v2101_v39 = vpop.permute.xlu0 %2100 }
 0x2c0   : >> { %v1396_v47 = vadd.f32 %v1382_v55, %v1367_v63  ;;  %v1371_v45 = vadd.f32 %v1363_v56, %v1305_v44  ;;  %v1397_v56 = vadd.f32 %v1386_v51, %v1368_v50  ;;  %v1401_v1 = vadd.f32 %v1386_v51, %v1372_v42 }
 0x2c1   : >> { %v1403_v6 = vmul.f32 0.5, %v1395_v41  ;;  %v1399_v7 = vadd.f32 %v1378_v52, %v1370_v2  ;;  %2104 = vtanh.f32 %v1398_v5  ;;  %v1402_v60 = vadd.f32 %v1390_v59, %v1373_v49 }
 0x2c2   : >> { %v1404_v54 = vmul.f32 0.5, %v1396_v47  ;;  %v1400_v8 = vadd.f32 %v1382_v55, %v1371_v45  ;;  %v1405_v2 = vmul.f32 0.5, %v1397_v56  ;;  %v1408_v58 = vmul.f32 0.5, %v1401_v1 }
 0x2c3   : >> { %2106 = vtanh.f32 %v1403_v6  ;;  %v1406_v46 = vmul.f32 0.5, %v1399_v7  ;;  %v2102_v48 = vunpack.i.l.bf16 %v2101_v39 }
 0x2c4   : >> { %2108 = vtanh.f32 %v1404_v54  ;;  %v1407_v53 = vmul.f32 0.5, %v1400_v8  ;;  %v2103_v54 = vunpack.i.h.bf16 %v2101_v39 }
 0x2c5   : >> { %2110 = vtanh.f32 %v1406_v46 }
 0x2c6   : >> { %2112 = vtanh.f32 %v1407_v53 }
 0x2c7   : >> { %2114 = vtanh.f32 %v1402_v60 }
 0x2c8   : >> { %2116 = vtanh.f32 %v1405_v2 }
 0x2c9   : >> { %2118 = vtanh.f32 %v1408_v58 }
 0x2cb   : >> { %v2105_v52 = vpop.eup %2104 }
 0x2cd   : >> { %v2107_v4 = vpop.eup %2106 }
 0x2ce   : >> { %v2109_v55 = vpop.eup %2108  ;;  %v1415_v5 = vmul.f32 0.5, %v2107_v4 }
 0x2cf   : >> { %v2111_v6 = vpop.eup %2110  ;;  %v1416_v7 = vmul.f32 0.5, %v2109_v55 }
 0x2d0   : >> { %v2113_v57 = vpop.eup %2112  ;;  %v1421_v3 = vadd.f32 0.5, %v1415_v5  ;;  %v1418_v8 = vmul.f32 0.5, %v2111_v6 }
 0x2d1   : >> { %v1422_v62 = vadd.f32 0.5, %v1416_v7  ;;  %v1419_v63 = vmul.f32 0.5, %v2113_v57  ;;  %v2115_v41 = vpop.eup %2114 }
 0x2d2   : >> { %v1424_v59 = vadd.f32 0.5, %v1418_v8  ;;  %v1433_v40 = vmul.f32 %v2105_v52, %v1421_v3  ;;  %v2117_v51 = vpop.eup %2116 }
 0x2d3   : >> { %v1431_v44 = vmul.f32 %v1429_v61, %v1422_v62  ;;  %v1425_v43 = vadd.f32 0.5, %v1419_v63  ;;  %v2119_v60 = vpop.eup %2118  ;;  %v1417_v2 = vmul.f32 0.5, %v2117_v51 }
 0x2d4   : >> { %v1434_v47 = vmul.f32 %v2115_v41, %v1424_v59  ;;  %v1420_v4 = vmul.f32 0.5, %v2119_v60 }
 0x2d5   : >> { %v1432_v45 = vmul.f32 %v1430_v0, %v1425_v43  ;;  %v1435_v49 = vadd.f32 %v1433_v40, %v1431_v44  ;;  %v1423_v58 = vadd.f32 0.5, %v1417_v2 }
 0x2d6   : >> { %v1426_v5 = vadd.f32 0.5, %v1420_v4 }
 0x2d7   : >> { %v1436_v46 = vadd.f32 %v1434_v47, %v1432_v45  ;;  %2120 = vtanh.f32 %v1435_v49  ;;  %v1467_v50 = vsub.f32 %v1435_v49, %v1429_v61 }
 0x2d9   : >> { %2122 = vtanh.f32 %v1436_v46  ;;  %v1468_v53 = vsub.f32 %v1436_v46, %v1430_v0  ;;  %v1469_v42 = vmul.f32 %v2102_v48, %v1467_v50 }
 0x2db   : >> { %v1470_v56 = vmul.f32 %v2103_v54, %v1468_v53  ;;  %v1471_v1 = vadd.f32 %v1469_v42, %v1429_v61 }
 0x2dd   : >> { %v1472_v52 = vadd.f32 %v1470_v56, %v1430_v0  ;;  %1473 = vst [vmem:[#allocation4] sm:$0xff] %v1471_v1 }
 0x2df   : >> { %1474 = vst [vmem:[#allocation4 + $0x8] sm:$0xff] %v1472_v52 }
 0x2e1   : >> { %v2121_v55 = vpop.eup %2120 }
 0x2e2   : >> { %v1439_v6 = vmul.f32 %v2121_v55, %v1423_v58 }
 0x2e3   : >> { %v2123_v7 = vpop.eup %2122 }
 0x2e4   : >> { %v1440_v57 = vmul.f32 %v2123_v7, %v1426_v5  ;;  %v1449_v3 = vsub.f32 %v1439_v6, %v2892_v37  ;;  %v1475_v63 = vmul.f32 %v2102_v48, %v1439_v6 }
 0x2e6   : >> { %v1450_v8 = vsub.f32 %v1440_v57, %v2894_v38  ;;  %v1461_v62 = vmul.f32 %v2102_v48, %v1449_v3  ;;  %v1476_v61 = vmul.f32 %v2103_v54, %v1440_v57  ;;  %1096 = sbr.rel (!%p1094_p9) target bundleno = 452 (0x1c4), region = 164  ;;  %v1498_v44 = vld [vmem:[#allocation4 + $0x8] sm:$0xff] (%p1094_p9) }
 0x2e7   : > { %1500 = vst [vmem:[%s2815_s2 + $0x8] sm:$0xff] (%p1094_p9), %v1498_v44 }
 0x2e8   : >> { %v1462_v59 = vmul.f32 %v2103_v54, %v1450_v8  ;;  %v1463_v0 = vadd.f32 %v1461_v62, %v2892_v37  ;;  %v1933_v39 = vpack.c.bf16 %v1476_v61, %v1475_v63 }
 0x2ea   : >> { %v1464_v40 = vadd.f32 %v1462_v59, %v2894_v38  ;;  %1465 = vst [vmem:[#allocation3] sm:$0xff] %v1463_v0  ;;  %1934 = vst [vmem:[%s1487_s16] sm:$0xff] %v1933_v39   ;;  %v1497_v38 = vld [vmem:[#allocation4] sm:$0xff] (%p1094_p9) }
 0x2eb   : > { %1499 = vst [vmem:[%s2815_s2] sm:$0xff] (%p1094_p9), %v1497_v38 }
 0x2ec   : >> { %1466 = vst [vmem:[#allocation3 + $0x8] sm:$0xff] %v1464_v40 }
 0x2f1   : > { %v1493_v41 = vld [vmem:[#allocation3] sm:$0xff] }
 0x2f2   : > { %1495 = vst [vmem:[%s2811_s22] sm:$0xff] %v1493_v41 }
 0x2f3   : > { %v1494_v37 = vld [vmem:[#allocation3 + $0x8] sm:$0xff] }
 0x2f4   : > { %1496 = vst [vmem:[%s2811_s22 + $0x8] sm:$0xff] %v1494_v37  ;;  %s2212_s22 = scalar_lea.vmem %s2925_s19, 256 }
 0x2f5   : > { %p2213_p7 = scmp.ne.s32.totalorder %s2925_s19, %s2212_s22  ;;  %p2220_p8 = scmp.lt.s32.totalorder %s2218_s12, %s2212_s22 }
 0x2f7   : > { %p2214_p13 = pnand %p2213_p7, %p3121_p12  ;;  %p2221_p0 = por %p2220_p8, %p2219_p4 }
 0x2f9   : > { %p2215_p1 = pneg %p2214_p13 }
 0x2fb   : > { %p2222_p11 = pnand %p2221_p0, %p2215_p1 }
 0x2fd   : > { %2225 = shalt.err (!%p2222_p11)
}
 0x2fe   : > { %s2226_s30 = scalar_lea.hbm %s2923_s8, 256  ;;  %s2230_s23 = scalar_lea.hbm %s3056_s6, 512 }
 0x2ff   : > { %p2227_p3 = scmp.ne.s32.totalorder %s2923_s8, %s2226_s30  ;;  %p2231_p6 = scmp.lt.u32.totalorder %s2923_s8, %s3056_s6 }
 0x300   : > { %p2232_p2 = scmp.lt.u32.totalorder %s2230_s23, %s2226_s30  ;;  %p2234_p7 = scmp.lt.u32.totalorder %s2226_s30, %s2923_s8 }
 0x301   : > { %p2228_p10 = pnand %p2227_p3, %p3121_p12 }
 0x302   : > { %p2233_p9 = por %p2232_p2, %p2231_p6 }
 0x303   : > { %p2229_p5 = pneg %p2228_p10 }
 0x304   : > { %p2235_p13 = por %p2234_p7, %p2233_p9 }
 0x306   : > { %p2236_p1 = pnand %p2235_p13, %p2229_p5 }
 0x308   : > { %2239 = shalt.err (!%p2236_p1)
}
 0x309   : > { %s2380_s15 = smov 128   ;;  %s2381_s10 = smov 8  }
 0x30a   : > { %1944 = dma.vmem_to_hbm [thread:$0]  (%p3121_p12), %s2925_s19, 256, %s2923_s8, %s2934_s13, %s2380_s15, %s2380_s15, %s2381_s10  }
 0x30b   : > { %s1915_s22 = sshll.u32 %s2354_s27, 6  ;;  %s1534_s30 = sshll.u32 %s2807_s11, 4  ;;  %s2968_s30 = int_to_ptr.vmem [resolvable:$true] %s1534_s30 }
 0x30c   : > { %s2965_s12 = scalar_lea.hbm %s3055_s5, %s1915_s22  ;;  %s1570_s18 = sshll.u32 %s2815_s2, 4  ;;  %s2998_s18 = int_to_ptr.vmem [resolvable:$true] %s1570_s18 }
 0x30d   : > { %s1502_s16 = scalar_lea.sflag [#allocation7], %s2629_s17  ;;  %s2240_s23 = scalar_lea.vmem %s2968_s30, 1024 }
 0x30e   : > { %p2241_p4 = scmp.ne.s32.totalorder %s2968_s30, %s2240_s23  ;;  %s2382_s19 = smov [#allocation11]  }
 0x30f   : > { %s2244_s27 = sshll.u32 %s2382_s19, 4  ;;  %s2245_s27 = int_to_ptr.vmem [resolvable:$false] %s2244_s27 }
 0x310   : > { %p2242_p8 = pnand %p2241_p4, %p3121_p12  ;;  %s2246_s8 = scalar_lea.vmem %s2245_s27, 2048 }
 0x311   : > { %p2247_p11 = scmp.lt.s32.totalorder %s2968_s30, %s2245_s27  ;;  %p2248_p3 = scmp.lt.s32.totalorder %s2246_s8, %s2240_s23 }
 0x312   : > { %p2243_p0 = pneg %p2242_p8 }
 0x313   : > { %p2249_p10 = por %p2248_p3, %p2247_p11 }
 0x315   : > { %p2250_p5 = pnand %p2249_p10, %p2243_p0 }
 0x317   : > { %2253 = shalt.err (!%p2250_p5)
}
 0x318   : > { %s2254_s11 = scalar_lea.hbm %s2965_s12, 1024  ;;  %s2258_s22 = scalar_lea.hbm %s3055_s5, 2048 }
 0x319   : > { %p2255_p6 = scmp.ne.s32.totalorder %s2965_s12, %s2254_s11  ;;  %p2259_p7 = scmp.lt.u32.totalorder %s2965_s12, %s3055_s5 }
 0x31a   : > { %p2260_p13 = scmp.lt.u32.totalorder %s2258_s22, %s2254_s11  ;;  %p2262_p4 = scmp.lt.u32.totalorder %s2254_s11, %s2965_s12 }
 0x31b   : > { %p2256_p2 = pnand %p2255_p6, %p3121_p12 }
 0x31c   : > { %p2261_p1 = por %p2260_p13, %p2259_p7 }
 0x31d   : > { %p2257_p9 = pneg %p2256_p2 }
 0x31e   : > { %p2263_p8 = por %p2262_p4, %p2261_p1 }
 0x320   : > { %p2264_p0 = pnand %p2263_p8, %p2257_p9 }
 0x322   : > { %2267 = shalt.err (!%p2264_p0)
}
 0x323   : > { %s2383_s23 = smov 64   ;;  %s2384_s19 = smov 4  }
 0x324   : > { %1943 = dma.vmem_to_hbm [thread:$0]  (%p3121_p12), %s2968_s30, 1024, %s2965_s12, %s1502_s16, %s2383_s23, %s2380_s15, %s2384_s19  }
 0x325   : > { %s2268_s27 = scalar_lea.vmem %s2998_s18, 256  ;;  %s2385_s8 = smov [#allocation14]  }
 0x326   : > { %p2269_p11 = scmp.ne.s32.totalorder %s2998_s18, %s2268_s27  ;;  %s2272_s11 = sshll.u32 %s2385_s8, 4  ;;  %s2273_s11 = int_to_ptr.vmem [resolvable:$false] %s2272_s11 }
 0x327   : > { %s2274_s28 = scalar_lea.vmem %s2273_s11, 512  ;;  %p2275_p5 = scmp.lt.s32.totalorder %s2998_s18, %s2273_s11 }
 0x328   : > { %p2270_p3 = pnand %p2269_p11, %p3121_p12  ;;  %p2276_p6 = scmp.lt.s32.totalorder %s2274_s28, %s2268_s27 }
 0x32a   : > { %p2271_p10 = pneg %p2270_p3  ;;  %p2277_p2 = por %p2276_p6, %p2275_p5 }
 0x32c   : > { %p2278_p9 = pnand %p2277_p2, %p2271_p10 }
 0x32e   : > { %2281 = shalt.err (!%p2278_p9)
}
 0x32f   : > { %s2282_s17 = scalar_lea.hbm %s2930_s26, 256  ;;  %s2286_s30 = scalar_lea.hbm %s3057_s7, 512 }
 0x330   : > { %p2283_p7 = scmp.ne.s32.totalorder %s2930_s26, %s2282_s17  ;;  %p2287_p4 = scmp.lt.u32.totalorder %s2930_s26, %s3057_s7 }
 0x331   : > { %p2288_p8 = scmp.lt.u32.totalorder %s2286_s30, %s2282_s17  ;;  %p2290_p11 = scmp.lt.u32.totalorder %s2282_s17, %s2930_s26 }
 0x332   : > { %p2284_p13 = pnand %p2283_p7, %p3121_p12 }
 0x333   : > { %p2289_p0 = por %p2288_p8, %p2287_p4 }
 0x334   : > { %p2285_p1 = pneg %p2284_p13 }
 0x335   : > { %p2291_p3 = por %p2290_p11, %p2289_p0 }
 0x337   : > { %p2292_p10 = pnand %p2291_p3, %p2285_p1 }
 0x339   : > { %2295 = shalt.err (!%p2292_p10)
}
 0x33a   : > { %1945 = dma.vmem_to_hbm [thread:$0]  (%p3121_p12), %s2998_s18, 256, %s2930_s26, %s2934_s13, %s2380_s15, %s2380_s15, %s2381_s10  }
 0x33b PF: > { %s3122_s22 = sld [smem:[#allocation23_spill]]  ;;  %s1585_s20 = sand.u32 1, %s2342_s24  }
 0x33c   : > { %p3124_p6 = scmp.ge.s32.totalorder %s2362_s29, 2  ;;  %s1586_s9 = scalar_lea.sflag [#allocation7], %s1585_s20 }
 0x341   : > { %p3123_p5 = scmp.ne.s32.totalorder %s3122_s22, 0 }
 0x343   : > { %p1960_p2 = pnand %p3124_p6, %p3123_p5 }
 0x345   : > { %2333 = dma.done.wait (!%p1960_p2), %s1586_s9, 1024  }
 0x346   : > { %2335 = vsyncadd (!%p1960_p2), %s1586_s9, 4294966272  ;;  %s3125_s14 = sadd.s32 4294967294, %s2362_s29  }
 0x347   : > { %s1594_s23 = sand.u32 1, %s3125_s14  }
 0x348   : > { %s1595_s19 = scalar_lea.sflag [#allocation13], %s1594_s23 }
 0x349   : > { %2337 = dma.done.wait (!%p1960_p2), %s1595_s19, 512  }
 0x34a   : > { %2339 = vsyncadd (!%p1960_p2), %s1595_s19, 4294966784  ;;  %s30_s29 = sadd.s32 1, %s2362_s29   ;;  %s3126_s26 = sld [smem:[#allocation19_spill]] }
 0x34b   : > { %p27_p12 = scmp.ge.s32.totalorder %s30_s29, 4   ;;  %s3127_s13 = sld [smem:[#allocation22_spill]] }
 0x34c   : > { %s3128_s27 = sld [smem:[#allocation20_spill]]  ;;  %s3129_s28 = sld [smem:[#allocation21_spill]] }
 0x34d   : > { %s3130_s24 = smov %s2346_s25  ;;  %29 = sbr.rel (!%p27_p12) target bundleno = 12 (0xc), region = 175 }
 0x350   : > { %s3131_s25 = smov %s3126_s26 }
 0x351   : > { %s3132_s26 = smov %s3127_s13 }
 0x354   :  { %1609 = vsyncpa [#allocation6], 1 }
 0x355   :  { %1611 = vsyncpa [#allocation6 + $0x1], 1 }
 0x356   :  { %1612 = vsyncpa [#allocation9], 1 }
 0x357   :  { %1614 = vsyncpa [#allocation9 + $0x1], 1 }
 0x358   :  { %1615 = vsyncpa [#allocation7], 1 }
 0x359   :  { %1617 = vsyncpa [#allocation7 + $0x1], 1 }
 0x35a   :  { %1618 = vsyncpa [#allocation13], 1 }
 0x35b   :  { %1620 = vsyncpa [#allocation13 + $0x1], 1 }

</bundles_post_ra>
